<compile_context>
chip_gen: v5e
topology: v5e:2x2
jax: 0.10.0
libtpu: 0.0.40
codegen_flags: <defaults>
</compile_context>

<pallas_src>
import functools

import jax
import jax.numpy as jnp
from jax import lax
from jax.experimental import pallas as pl
from jax.experimental.pallas import tpu as pltpu


def _round_up(x, m):
    return ((x + m - 1) // m) * m


# PyTorch gate order is (i, f, g, o); we pack as (i, f, o, g) so the three
# sigmoid gates are one contiguous 3*Hp slice and tanh(g) one Hp slice.
_GATE_PERM = (0, 1, 3, 2)


def encoder_lstm_kernel(x_ref, wih_ref, whh_ref, bias_ref,
                        out_ref, hn_ref, cn_ref,
                        h_st, c_st, xg_st, *, seq_len, mask_tail):
    # x_ref:    [Bc, Tc, E]        embedded inputs for this (batch, time) block
    # wih_ref:  [E,  4*Hp]         input->gate weights (pre-transposed, gate-padded)
    # whh_ref:  [Hp, 4*Hp]         hidden->gate weights (pre-transposed, padded)
    # bias_ref: [1,  4*Hp]         b_ih + b_hh (gate-padded), f32
    # out_ref:  [Bc, Tc, Hp]       batch-first hidden-state outputs
    # hn_ref/cn_ref: [1, Bc, Hp]   final LSTM state
    # h_st/c_st: VMEM scratch [Bc, Hp] carried across the time grid axis
    # xg_st:     VMEM scratch [Bc, Tc, 4*Hp] staged input projection
    Bc, Tc, E = x_ref.shape
    Hp = h_st.shape[1]
    t_blk = pl.program_id(1)

    @pl.when(t_blk == 0)
    def _init():
        h_st[...] = jnp.zeros_like(h_st)
        c_st[...] = jnp.zeros_like(c_st)

    # Hoisted input projection: one MXU matmul for the whole chunk, bias folded.
    # Staged to VMEM scratch so the per-step slice is a cheap (8,128)-tiled vld.
    x = x_ref[...].reshape(Bc * Tc, E)
    xg = jnp.dot(x, wih_ref[...], preferred_element_type=jnp.float32) + bias_ref[...]
    xg_st[...] = xg.reshape(Bc, Tc, 4 * Hp)

    whh = whh_ref[...]

    # Carry h/c in vregs across the chunk (scratch only touched at chunk edges).
    h = h_st[...]
    c = c_st[...]

    def step(t, h, c):
        gates = xg_st[:, t, :] + jnp.dot(h.astype(whh.dtype), whh,
                                         preferred_element_type=jnp.float32)
        # Gate order (i, f, o, g): one sigmoid over the contiguous 3*Hp block.
        sig = jax.nn.sigmoid(gates[:, :3 * Hp])
        i_g = sig[:, 0 * Hp:1 * Hp]
        f_g = sig[:, 1 * Hp:2 * Hp]
        o_g = sig[:, 2 * Hp:3 * Hp]
        g_g = jnp.tanh(gates[:, 3 * Hp:4 * Hp])
        c_new = f_g * c + i_g * g_g
        h_new = o_g * jnp.tanh(c_new)
        if mask_tail:
            valid = (t_blk * Tc + t) < seq_len
            c_new = jnp.where(valid, c_new, c)
            h_new = jnp.where(valid, h_new, h)
        out_ref[:, t, :] = h_new          # lane-dense, batch-first store
        return h_new, c_new

    if Tc <= 32:
        # Short chunk: static unroll (full LLO scheduler visibility).
        for t in range(Tc):
            h, c = step(t, h, c)
    else:
        def body(t, carry):
            return step(t, *carry)
        h, c = lax.fori_loop(0, Tc, body, (h, c), unroll=8)

    h_st[...] = h
    c_st[...] = c

    @pl.when(t_blk == pl.num_programs(1) - 1)
    def _finalize():
        hn_ref[0] = h
        cn_ref[0] = c


def _pack_gate_weights(w, H, Hp):
    """PyTorch-layout [4H, In] -> [In, 4*Hp]; gate order (i,f,o,g), each gate 128-aligned."""
    _, n_in = w.shape
    w4 = w.reshape(4, H, n_in)[jnp.array(_GATE_PERM)]   # [gate, h_out, in]
    w4 = jnp.transpose(w4, (2, 0, 1))                   # [in, gate, h_out]
    w4 = jnp.pad(w4, ((0, 0), (0, 0), (0, Hp - H)))     # pad h_out -> Hp (zeros)
    return w4.reshape(n_in, 4 * Hp)


def _pack_bias(b_ih, b_hh, H, Hp):
    b = (b_ih + b_hh).reshape(4, H)[jnp.array(_GATE_PERM)]
    b = jnp.pad(b, ((0, 0), (0, Hp - H)))
    return b.reshape(1, 4 * Hp).astype(jnp.float32)


def _resident_spec(block_shape, index_map, single_buffer):
    """BlockSpec for grid-invariant (weight) operands.

    When the resident weight footprint is large, request single buffering so
    only one VMEM copy is kept (default double-buffering would hold two copies
    of weights whose block index never changes — fatal at production H on
    v7x's 64 MiB VMEM)."""
    if single_buffer:
        try:
            return pl.BlockSpec(block_shape, index_map, pipeline_mode=pl.Buffered(1))
        except (TypeError, AttributeError):
            pass
    return pl.BlockSpec(block_shape, index_map)


@functools.partial(jax.jit, static_argnames=("compute_dtype", "batch_blocks"))
def input_encoder_forward(tokens, emb, w_ih, w_hh, b_ih, b_hh,
                          compute_dtype=jnp.bfloat16, batch_blocks=1):
    """tokens: [B, T] int32. Returns (output [B,T,H], (h_n [1,B,H], c_n [1,B,H]))."""
    B, T = tokens.shape
    E = emb.shape[1]
    H = w_hh.shape[1]
    Hp = _round_up(H, 128)

    # Embedding lookup outside the kernel (padding_idx=0 row is zero in `emb`);
    # keeps the (possibly huge) vocab table out of VMEM entirely.
    x_emb = emb[tokens].astype(compute_dtype)                            # [B, T, E]

    # Pre-transpose + gate-pad the weights so every gate block is lane-aligned.
    wih_p = _pack_gate_weights(w_ih, H, Hp).astype(compute_dtype)        # [E, 4Hp]
    whh_p = _pack_gate_weights(w_hh, H, Hp)
    whh_p = jnp.pad(whh_p, ((0, Hp - H), (0, 0))).astype(compute_dtype)  # [Hp, 4Hp]
    bias_p = _pack_bias(b_ih, b_hh, H, Hp)                               # [1, 4Hp] f32

    # Time chunking: cap the per-chunk unroll / VMEM block. Prefer a divisor of
    # T that is a multiple of 8; otherwise pad T and mask the tail in-kernel.
    T_CAP = 64
    if T <= T_CAP:
        t_chunk = T
    else:
        t_chunk = 0
        for cand in range(T_CAP, 7, -8):
            if T % cand == 0:
                t_chunk = cand
                break
        if t_chunk == 0:
            t_chunk = T_CAP
    T_pad = _round_up(T, t_chunk)
    if T_pad != T:
        x_emb = jnp.pad(x_emb, ((0, 0), (0, T_pad - T), (0, 0)))
    n_t = T_pad // t_chunk

    # Batch blocking: default 1 (v5e/v6e have one TensorCore — splitting only
    # re-runs the serial recurrence). On v7x pass batch_blocks=2 when B%16==0.
    # TODO(synk): use pltpu.CORE_PARALLEL on the batch axis for explicit v7x sharding.
    assert B % batch_blocks == 0
    b_chunk = B // batch_blocks
    assert batch_blocks == 1 or b_chunk % 8 == 0, "batch blocks must stay sublane-aligned"

    # VMEM budgeting: single-buffer resident weights when they are big, and
    # raise the scoped VMEM limit to the actual footprint when needed.
    itemsize = jnp.dtype(compute_dtype).itemsize
    w_bytes = (E * 4 * Hp + Hp * 4 * Hp) * itemsize + 4 * Hp * 4
    single_buffer_weights = w_bytes > (8 << 20)
    w_resident = w_bytes if single_buffer_weights else 2 * w_bytes
    stream_bytes = 2 * (b_chunk * t_chunk * (E * itemsize + Hp * 4)     # x + out blocks
                        + 2 * b_chunk * Hp * 4)                          # hn/cn blocks
    scratch_bytes = 2 * b_chunk * Hp * 4 + b_chunk * t_chunk * 4 * Hp * 4
    est = w_resident + stream_bytes + scratch_bytes
    vmem_limit = min(int(est * 1.25) + (2 << 20), 128 << 20) if est > (28 << 20) else None

    kernel = functools.partial(encoder_lstm_kernel,
                               seq_len=T, mask_tail=(T_pad != T))

    out_p, hn_p, cn_p = pl.pallas_call(
        kernel,
        out_shape=(
            jax.ShapeDtypeStruct((B, T_pad, Hp), jnp.float32),
            jax.ShapeDtypeStruct((1, B, Hp), jnp.float32),
            jax.ShapeDtypeStruct((1, B, Hp), jnp.float32),
        ),
        grid_spec=pltpu.PrefetchScalarGridSpec(
            num_scalar_prefetch=0,
            grid=(batch_blocks, n_t),
            in_specs=[
                pl.BlockSpec((b_chunk, t_chunk, E), lambda b, t: (b, t, 0)),
                _resident_spec((E, 4 * Hp), lambda b, t: (0, 0), single_buffer_weights),
                _resident_spec((Hp, 4 * Hp), lambda b, t: (0, 0), single_buffer_weights),
                _resident_spec((1, 4 * Hp), lambda b, t: (0, 0), single_buffer_weights),
            ],
            out_specs=[
                pl.BlockSpec((b_chunk, t_chunk, Hp), lambda b, t: (b, t, 0)),
                pl.BlockSpec((1, b_chunk, Hp), lambda b, t: (0, b, 0)),
                pl.BlockSpec((1, b_chunk, Hp), lambda b, t: (0, b, 0)),
            ],
            scratch_shapes=[
                pltpu.VMEM((b_chunk, Hp), jnp.float32),               # running h
                pltpu.VMEM((b_chunk, Hp), jnp.float32),               # running c
                pltpu.VMEM((b_chunk, t_chunk, 4 * Hp), jnp.float32),  # staged xg
            ],
        ),
        compiler_params=pltpu.CompilerParams(
            dimension_semantics=("parallel", "arbitrary"),
            vmem_limit_bytes=vmem_limit),
    )(x_emb, wih_p, whh_p, bias_p)

    # Strip the internal padding (no-op on T when T_pad==T, on H when H%128==0).
    output = out_p[:, :T, :H]
    h_n = hn_p[:, :, :H]
    c_n = cn_p[:, :, :H]
    return output, (h_n, c_n)


def lstm_reference(tokens, emb, w_ih, w_hh, b_ih, b_hh):
    """Pure-JAX f32 reference matching nn.Embedding + nn.LSTM(batch_first=True)."""
    x = emb[tokens]                                  # [B, T, E]
    B, _, _ = x.shape
    H = w_hh.shape[1]

    def step(carry, x_t):
        h, c = carry
        gates = x_t @ w_ih.T + h @ w_hh.T + b_ih + b_hh
        i, f, g, o = jnp.split(gates, 4, axis=-1)
        i = jax.nn.sigmoid(i)
        f = jax.nn.sigmoid(f)
        g = jnp.tanh(g)
        o = jax.nn.sigmoid(o)
        c = f * c + i * g
        h = o * jnp.tanh(c)
        return (h, c), h

    init = (jnp.zeros((B, H), jnp.float32), jnp.zeros((B, H), jnp.float32))
    (h, c), ys = jax.lax.scan(step, init, jnp.swapaxes(x, 0, 1))
    return jnp.swapaxes(ys, 0, 1), h[None], c[None]


if __name__ == "__main__":
    # Small config consistent with InputEncoder(vocab_size, embedding_size,
    # hidden_size, layers=1, rnn_type='LSTM').
    VOCAB, EMB, HID = 32, 16, 32
    B, T = 2, 8

    key = jax.random.PRNGKey(0)
    k_tok, k_emb, k_wih, k_whh, k_bih, k_bhh = jax.random.split(key, 6)

    tokens = jax.random.randint(k_tok, (B, T), 0, VOCAB, dtype=jnp.int32)

    # nn.Embedding: N(0,1), padding_idx=0 row zeroed.
    emb = jax.random.normal(k_emb, (VOCAB, EMB), jnp.float32)
    emb = emb.at[0].set(0.0)

    # nn.LSTM: uniform(-1/sqrt(H), 1/sqrt(H)) for all weights/biases.
    bound = 1.0 / jnp.sqrt(jnp.float32(HID))
    w_ih = jax.random.uniform(k_wih, (4 * HID, EMB), jnp.float32, -bound, bound)
    w_hh = jax.random.uniform(k_whh, (4 * HID, HID), jnp.float32, -bound, bound)
    b_ih = jax.random.uniform(k_bih, (4 * HID,), jnp.float32, -bound, bound)
    b_hh = jax.random.uniform(k_bhh, (4 * HID,), jnp.float32, -bound, bound)

    ref_out, ref_h, ref_c = lstm_reference(tokens, emb, w_ih, w_hh, b_ih, b_hh)

    # f32 MXU-operand path: strict check against the reference.
    output, (h_n, c_n) = input_encoder_forward(
        tokens, emb, w_ih, w_hh, b_ih, b_hh, compute_dtype=jnp.float32)
    jax.block_until_ready((output, h_n, c_n))

    assert output.shape == (B, T, HID)
    assert h_n.shape == (1, B, HID) and c_n.shape == (1, B, HID)
    assert jnp.allclose(output, ref_out, atol=2e-3, rtol=2e-3)
    assert jnp.allclose(h_n, ref_h, atol=2e-3, rtol=2e-3)
    assert jnp.allclose(c_n, ref_c, atol=2e-3, rtol=2e-3)

    # bf16 MXU-operand path (default; 2x MXU rate / half weight VMEM on all
    # generations): looser tolerance since matmul operands are rounded to bf16.
    out_bf, (h_bf, c_bf) = input_encoder_forward(
        tokens, emb, w_ih, w_hh, b_ih, b_hh, compute_dtype=jnp.bfloat16)
    jax.block_until_ready((out_bf, h_bf, c_bf))
    assert jnp.allclose(out_bf, ref_out, atol=5e-2, rtol=5e-2)
    assert jnp.allclose(h_bf, ref_h, atol=5e-2, rtol=5e-2)
    assert jnp.allclose(c_bf, ref_c, atol=5e-2, rtol=5e-2)

    print("KERNEL_OK")
</pallas_src>

<mosaic_0001>
module attributes {stable_mosaic.version = 11 : i64} {
  func.func @encoder_lstm_kernel(%arg0: i32, %arg1: i32, %arg2: memref<2x8x16xf32, #tpu.memory_space<vmem>>, %arg3: memref<16x512xf32, #tpu.memory_space<vmem>>, %arg4: memref<128x512xf32, #tpu.memory_space<vmem>>, %arg5: memref<1x512xf32, #tpu.memory_space<vmem>>, %arg6: memref<2x8x128xf32, #tpu.memory_space<vmem>>, %arg7: memref<1x2x128xf32, #tpu.memory_space<vmem>>, %arg8: memref<1x2x128xf32, #tpu.memory_space<vmem>>, %arg9: memref<2x128xf32, #tpu.memory_space<vmem>>, %arg10: memref<2x128xf32, #tpu.memory_space<vmem>>, %arg11: memref<2x8x512xf32, #tpu.memory_space<vmem>>) attributes {dimension_semantics = [#tpu.dimension_semantics<parallel>, #tpu.dimension_semantics<arbitrary>], iteration_bounds = array<i64: 1, 1>, scalar_prefetch = 0 : i64, scratch_operands = 3 : i64, tpu.core_type = #tpu.core_type<tc>, window_params = [{transform_indices = @transform_0, window_bounds = array<i64: 2, 8, 16>}, {pipeline_mode = #tpu.pipeline_mode<synchronous>, transform_indices = @transform_1, window_bounds = array<i64: 16, 512>}, {pipeline_mode = #tpu.pipeline_mode<synchronous>, transform_indices = @transform_2, window_bounds = array<i64: 128, 512>}, {pipeline_mode = #tpu.pipeline_mode<synchronous>, transform_indices = @transform_3, window_bounds = array<i64: 1, 512>}, {transform_indices = @transform_4, window_bounds = array<i64: 2, 8, 128>}, {transform_indices = @transform_5, window_bounds = array<i64: 1, 2, 128>}, {transform_indices = @transform_6, window_bounds = array<i64: 1, 2, 128>}]} {
    %c0_i32 = arith.constant 0 : i32
    %0 = arith.cmpi eq, %arg1, %c0_i32 : i32
    %1 = arith.extui %0 : i1 to i32
    %c0_i32_0 = arith.constant 0 : i32
    %2 = arith.cmpi ne, %1, %c0_i32_0 : i32
    scf.if %2 {
      %cst_79 = arith.constant 0.000000e+00 : f32
      %204 = vector.broadcast %cst_79 : f32 to vector<2x128xf32>
      %c0_80 = arith.constant 0 : index
      %c0_81 = arith.constant 0 : index
      %205 = vector.load %arg9[%c0_80, %c0_81] : memref<2x128xf32, #tpu.memory_space<vmem>>, vector<2x128xf32>
      tpu.vector_store %arg9[%c0_80, %c0_81], %204 {strides = array<i32>} : memref<2x128xf32, #tpu.memory_space<vmem>>, vector<2x128xf32>,
      %cst_82 = arith.constant 0.000000e+00 : f32
      %206 = vector.broadcast %cst_82 : f32 to vector<2x128xf32>
      %c0_83 = arith.constant 0 : index
      %c0_84 = arith.constant 0 : index
      %207 = vector.load %arg10[%c0_83, %c0_84] : memref<2x128xf32, #tpu.memory_space<vmem>>, vector<2x128xf32>
      tpu.vector_store %arg10[%c0_83, %c0_84], %206 {strides = array<i32>} : memref<2x128xf32, #tpu.memory_space<vmem>>, vector<2x128xf32>,
    } else {
    }
    %c0 = arith.constant 0 : index
    %c0_1 = arith.constant 0 : index
    %c0_2 = arith.constant 0 : index
    %3 = vector.load %arg2[%c0, %c0_1, %c0_2] : memref<2x8x16xf32, #tpu.memory_space<vmem>>, vector<2x8x16xf32>
    %4 = vector.shape_cast %3 : vector<2x8x16xf32> to vector<16x16xf32>
    %c0_3 = arith.constant 0 : index
    %c0_4 = arith.constant 0 : index
    %5 = vector.load %arg3[%c0_3, %c0_4] : memref<16x512xf32, #tpu.memory_space<vmem>>, vector<16x512xf32>
    %cst = arith.constant dense<0.000000e+00> : vector<16x512xf32>
    %6 = tpu.matmul %4, %5, %cst {dimension_numbers = #tpu.dot_dimension_numbers<[1], [0], [0], [1], [0, 0, 1, 1], [], []>} : vector<16x16xf32>, vector<16x512xf32>, vector<16x512xf32> -> vector<16x512xf32>
    %c0_5 = arith.constant 0 : index
    %c0_6 = arith.constant 0 : index
    %7 = vector.load %arg5[%c0_5, %c0_6] : memref<1x512xf32, #tpu.memory_space<vmem>>, vector<1x512xf32>
    %8 = vector.broadcast %7 : vector<1x512xf32> to vector<16x512xf32>
    %9 = arith.addf %6, %8 : vector<16x512xf32>
    %10 = vector.shape_cast %9 : vector<16x512xf32> to vector<2x8x512xf32>
    %c0_7 = arith.constant 0 : index
    %c0_8 = arith.constant 0 : index
    %c0_9 = arith.constant 0 : index
    %11 = vector.load %arg11[%c0_7, %c0_8, %c0_9] : memref<2x8x512xf32, #tpu.memory_space<vmem>>, vector<2x8x512xf32>
    tpu.vector_store %arg11[%c0_7, %c0_8, %c0_9], %10 {strides = array<i32>} : memref<2x8x512xf32, #tpu.memory_space<vmem>>, vector<2x8x512xf32>,
    %c0_10 = arith.constant 0 : index
    %c0_11 = arith.constant 0 : index
    %12 = vector.load %arg4[%c0_10, %c0_11] : memref<128x512xf32, #tpu.memory_space<vmem>>, vector<128x512xf32>
    %c0_12 = arith.constant 0 : index
    %c0_13 = arith.constant 0 : index
    %13 = vector.load %arg9[%c0_12, %c0_13] : memref<2x128xf32, #tpu.memory_space<vmem>>, vector<2x128xf32>
    %c0_14 = arith.constant 0 : index
    %c0_15 = arith.constant 0 : index
    %14 = vector.load %arg10[%c0_14, %c0_15] : memref<2x128xf32, #tpu.memory_space<vmem>>, vector<2x128xf32>
    %c0_16 = arith.constant 0 : index
    %c0_17 = arith.constant 0 : index
    %c0_18 = arith.constant 0 : index
    %15 = vector.load %arg11[%c0_16, %c0_17, %c0_18] : memref<2x8x512xf32, #tpu.memory_space<vmem>>, vector<2x1x512xf32>
    %16 = vector.shape_cast %15 : vector<2x1x512xf32> to vector<2x512xf32>
    %cst_19 = arith.constant dense<0.000000e+00> : vector<2x512xf32>
    %17 = tpu.matmul %13, %12, %cst_19 {dimension_numbers = #tpu.dot_dimension_numbers<[1], [0], [0], [1], [0, 0, 1, 1], [], []>} : vector<2x128xf32>, vector<128x512xf32>, vector<2x512xf32> -> vector<2x512xf32>
    %18 = arith.addf %16, %17 : vector<2x512xf32>
    %19 = vector.extract_strided_slice %18 {offsets = [0, 0], sizes = [2, 384], strides = [1, 1]} : vector<2x512xf32> to vector<2x384xf32>
    %20 = arith.negf %19 : vector<2x384xf32>
    %21 = math.exp %20 : vector<2x384xf32>
    %cst_20 = arith.constant 1.000000e+00 : f32
    %22 = vector.broadcast %cst_20 : f32 to vector<2x384xf32>
    %23 = arith.addf %22, %21 : vector<2x384xf32>
    %24 = arith.divf %22, %23 : vector<2x384xf32>
    %25 = vector.extract_strided_slice %24 {offsets = [0, 0], sizes = [2, 128], strides = [1, 1]} : vector<2x384xf32> to vector<2x128xf32>
    %26 = vector.extract_strided_slice %24 {offsets = [0, 128], sizes = [2, 128], strides = [1, 1]} : vector<2x384xf32> to vector<2x128xf32>
    %27 = vector.extract_strided_slice %24 {offsets = [0, 256], sizes = [2, 128], strides = [1, 1]} : vector<2x384xf32> to vector<2x128xf32>
    %28 = vector.extract_strided_slice %18 {offsets = [0, 384], sizes = [2, 128], strides = [1, 1]} : vector<2x512xf32> to vector<2x128xf32>
    %29 = math.tanh %28 : vector<2x128xf32>
    %30 = arith.mulf %26, %14 : vector<2x128xf32>
    %31 = arith.mulf %25, %29 : vector<2x128xf32>
    %32 = arith.addf %30, %31 : vector<2x128xf32>
    %33 = math.tanh %32 : vector<2x128xf32>
    %34 = arith.mulf %27, %33 : vector<2x128xf32>
    %c0_21 = arith.constant 0 : index
    %c0_22 = arith.constant 0 : index
    %c0_23 = arith.constant 0 : index
    %35 = vector.load %arg6[%c0_21, %c0_22, %c0_23] : memref<2x8x128xf32, #tpu.memory_space<vmem>>, vector<2x1x128xf32>
    %36 = vector.shape_cast %35 : vector<2x1x128xf32> to vector<2x128xf32>
    %37 = vector.shape_cast %34 : vector<2x128xf32> to vector<2x1x128xf32>
    tpu.vector_store %arg6[%c0_21, %c0_22, %c0_23], %37 {strides = array<i32>} : memref<2x8x128xf32, #tpu.memory_space<vmem>>, vector<2x1x128xf32>,
    %c0_24 = arith.constant 0 : index
    %c1 = arith.constant 1 : index
    %c0_25 = arith.constant 0 : index
    %38 = vector.load %arg11[%c0_24, %c1, %c0_25] : memref<2x8x512xf32, #tpu.memory_space<vmem>>, vector<2x1x512xf32>
    %39 = vector.shape_cast %38 : vector<2x1x512xf32> to vector<2x512xf32>
    %cst_26 = arith.constant dense<0.000000e+00> : vector<2x512xf32>
    %40 = tpu.matmul %34, %12, %cst_26 {dimension_numbers = #tpu.dot_dimension_numbers<[1], [0], [0], [1], [0, 0, 1, 1], [], []>} : vector<2x128xf32>, vector<128x512xf32>, vector<2x512xf32> -> vector<2x512xf32>
    %41 = arith.addf %39, %40 : vector<2x512xf32>
    %42 = vector.extract_strided_slice %41 {offsets = [0, 0], sizes = [2, 384], strides = [1, 1]} : vector<2x512xf32> to vector<2x384xf32>
    %43 = arith.negf %42 : vector<2x384xf32>
    %44 = math.exp %43 : vector<2x384xf32>
    %cst_27 = arith.constant 1.000000e+00 : f32
    %45 = vector.broadcast %cst_27 : f32 to vector<2x384xf32>
    %46 = arith.addf %45, %44 : vector<2x384xf32>
    %47 = arith.divf %45, %46 : vector<2x384xf32>
    %48 = vector.extract_strided_slice %47 {offsets = [0, 0], sizes = [2, 128], strides = [1, 1]} : vector<2x384xf32> to vector<2x128xf32>
    %49 = vector.extract_strided_slice %47 {offsets = [0, 128], sizes = [2, 128], strides = [1, 1]} : vector<2x384xf32> to vector<2x128xf32>
    %50 = vector.extract_strided_slice %47 {offsets = [0, 256], sizes = [2, 128], strides = [1, 1]} : vector<2x384xf32> to vector<2x128xf32>
    %51 = vector.extract_strided_slice %41 {offsets = [0, 384], sizes = [2, 128], strides = [1, 1]} : vector<2x512xf32> to vector<2x128xf32>
    %52 = math.tanh %51 : vector<2x128xf32>
    %53 = arith.mulf %49, %32 : vector<2x128xf32>
    %54 = arith.mulf %48, %52 : vector<2x128xf32>
    %55 = arith.addf %53, %54 : vector<2x128xf32>
    %56 = math.tanh %55 : vector<2x128xf32>
    %57 = arith.mulf %50, %56 : vector<2x128xf32>
    %c0_28 = arith.constant 0 : index
    %c1_29 = arith.constant 1 : index
    %c0_30 = arith.constant 0 : index
    %58 = vector.load %arg6[%c0_28, %c1_29, %c0_30] : memref<2x8x128xf32, #tpu.memory_space<vmem>>, vector<2x1x128xf32>
    %59 = vector.shape_cast %58 : vector<2x1x128xf32> to vector<2x128xf32>
    %60 = vector.shape_cast %57 : vector<2x128xf32> to vector<2x1x128xf32>
    tpu.vector_store %arg6[%c0_28, %c1_29, %c0_30], %60 {strides = array<i32>} : memref<2x8x128xf32, #tpu.memory_space<vmem>>, vector<2x1x128xf32>,
    %c0_31 = arith.constant 0 : index
    %c2 = arith.constant 2 : index
    %c0_32 = arith.constant 0 : index
    %61 = vector.load %arg11[%c0_31, %c2, %c0_32] : memref<2x8x512xf32, #tpu.memory_space<vmem>>, vector<2x1x512xf32>
    %62 = vector.shape_cast %61 : vector<2x1x512xf32> to vector<2x512xf32>
    %cst_33 = arith.constant dense<0.000000e+00> : vector<2x512xf32>
    %63 = tpu.matmul %57, %12, %cst_33 {dimension_numbers = #tpu.dot_dimension_numbers<[1], [0], [0], [1], [0, 0, 1, 1], [], []>} : vector<2x128xf32>, vector<128x512xf32>, vector<2x512xf32> -> vector<2x512xf32>
    %64 = arith.addf %62, %63 : vector<2x512xf32>
    %65 = vector.extract_strided_slice %64 {offsets = [0, 0], sizes = [2, 384], strides = [1, 1]} : vector<2x512xf32> to vector<2x384xf32>
    %66 = arith.negf %65 : vector<2x384xf32>
    %67 = math.exp %66 : vector<2x384xf32>
    %cst_34 = arith.constant 1.000000e+00 : f32
    %68 = vector.broadcast %cst_34 : f32 to vector<2x384xf32>
    %69 = arith.addf %68, %67 : vector<2x384xf32>
    %70 = arith.divf %68, %69 : vector<2x384xf32>
    %71 = vector.extract_strided_slice %70 {offsets = [0, 0], sizes = [2, 128], strides = [1, 1]} : vector<2x384xf32> to vector<2x128xf32>
    %72 = vector.extract_strided_slice %70 {offsets = [0, 128], sizes = [2, 128], strides = [1, 1]} : vector<2x384xf32> to vector<2x128xf32>
    %73 = vector.extract_strided_slice %70 {offsets = [0, 256], sizes = [2, 128], strides = [1, 1]} : vector<2x384xf32> to vector<2x128xf32>
    %74 = vector.extract_strided_slice %64 {offsets = [0, 384], sizes = [2, 128], strides = [1, 1]} : vector<2x512xf32> to vector<2x128xf32>
    %75 = math.tanh %74 : vector<2x128xf32>
    %76 = arith.mulf %72, %55 : vector<2x128xf32>
    %77 = arith.mulf %71, %75 : vector<2x128xf32>
    %78 = arith.addf %76, %77 : vector<2x128xf32>
    %79 = math.tanh %78 : vector<2x128xf32>
    %80 = arith.mulf %73, %79 : vector<2x128xf32>
    %c0_35 = arith.constant 0 : index
    %c2_36 = arith.constant 2 : index
    %c0_37 = arith.constant 0 : index
    %81 = vector.load %arg6[%c0_35, %c2_36, %c0_37] : memref<2x8x128xf32, #tpu.memory_space<vmem>>, vector<2x1x128xf32>
    %82 = vector.shape_cast %81 : vector<2x1x128xf32> to vector<2x128xf32>
    %83 = vector.shape_cast %80 : vector<2x128xf32> to vector<2x1x128xf32>
    tpu.vector_store %arg6[%c0_35, %c2_36, %c0_37], %83 {strides = array<i32>} : memref<2x8x128xf32, #tpu.memory_space<vmem>>, vector<2x1x128xf32>,
    %c0_38 = arith.constant 0 : index
    %c3 = arith.constant 3 : index
    %c0_39 = arith.constant 0 : index
    %84 = vector.load %arg11[%c0_38, %c3, %c0_39] : memref<2x8x512xf32, #tpu.memory_space<vmem>>, vector<2x1x512xf32>
    %85 = vector.shape_cast %84 : vector<2x1x512xf32> to vector<2x512xf32>
    %cst_40 = arith.constant dense<0.000000e+00> : vector<2x512xf32>
    %86 = tpu.matmul %80, %12, %cst_40 {dimension_numbers = #tpu.dot_dimension_numbers<[1], [0], [0], [1], [0, 0, 1, 1], [], []>} : vector<2x128xf32>, vector<128x512xf32>, vector<2x512xf32> -> vector<2x512xf32>
    %87 = arith.addf %85, %86 : vector<2x512xf32>
    %88 = vector.extract_strided_slice %87 {offsets = [0, 0], sizes = [2, 384], strides = [1, 1]} : vector<2x512xf32> to vector<2x384xf32>
    %89 = arith.negf %88 : vector<2x384xf32>
    %90 = math.exp %89 : vector<2x384xf32>
    %cst_41 = arith.constant 1.000000e+00 : f32
    %91 = vector.broadcast %cst_41 : f32 to vector<2x384xf32>
    %92 = arith.addf %91, %90 : vector<2x384xf32>
    %93 = arith.divf %91, %92 : vector<2x384xf32>
    %94 = vector.extract_strided_slice %93 {offsets = [0, 0], sizes = [2, 128], strides = [1, 1]} : vector<2x384xf32> to vector<2x128xf32>
    %95 = vector.extract_strided_slice %93 {offsets = [0, 128], sizes = [2, 128], strides = [1, 1]} : vector<2x384xf32> to vector<2x128xf32>
    %96 = vector.extract_strided_slice %93 {offsets = [0, 256], sizes = [2, 128], strides = [1, 1]} : vector<2x384xf32> to vector<2x128xf32>
    %97 = vector.extract_strided_slice %87 {offsets = [0, 384], sizes = [2, 128], strides = [1, 1]} : vector<2x512xf32> to vector<2x128xf32>
    %98 = math.tanh %97 : vector<2x128xf32>
    %99 = arith.mulf %95, %78 : vector<2x128xf32>
    %100 = arith.mulf %94, %98 : vector<2x128xf32>
    %101 = arith.addf %99, %100 : vector<2x128xf32>
    %102 = math.tanh %101 : vector<2x128xf32>
    %103 = arith.mulf %96, %102 : vector<2x128xf32>
    %c0_42 = arith.constant 0 : index
    %c3_43 = arith.constant 3 : index
    %c0_44 = arith.constant 0 : index
    %104 = vector.load %arg6[%c0_42, %c3_43, %c0_44] : memref<2x8x128xf32, #tpu.memory_space<vmem>>, vector<2x1x128xf32>
    %105 = vector.shape_cast %104 : vector<2x1x128xf32> to vector<2x128xf32>
    %106 = vector.shape_cast %103 : vector<2x128xf32> to vector<2x1x128xf32>
    tpu.vector_store %arg6[%c0_42, %c3_43, %c0_44], %106 {strides = array<i32>} : memref<2x8x128xf32, #tpu.memory_space<vmem>>, vector<2x1x128xf32>,
    %c0_45 = arith.constant 0 : index
    %c4 = arith.constant 4 : index
    %c0_46 = arith.constant 0 : index
    %107 = vector.load %arg11[%c0_45, %c4, %c0_46] : memref<2x8x512xf32, #tpu.memory_space<vmem>>, vector<2x1x512xf32>
    %108 = vector.shape_cast %107 : vector<2x1x512xf32> to vector<2x512xf32>
    %cst_47 = arith.constant dense<0.000000e+00> : vector<2x512xf32>
    %109 = tpu.matmul %103, %12, %cst_47 {dimension_numbers = #tpu.dot_dimension_numbers<[1], [0], [0], [1], [0, 0, 1, 1], [], []>} : vector<2x128xf32>, vector<128x512xf32>, vector<2x512xf32> -> vector<2x512xf32>
    %110 = arith.addf %108, %109 : vector<2x512xf32>
    %111 = vector.extract_strided_slice %110 {offsets = [0, 0], sizes = [2, 384], strides = [1, 1]} : vector<2x512xf32> to vector<2x384xf32>
    %112 = arith.negf %111 : vector<2x384xf32>
    %113 = math.exp %112 : vector<2x384xf32>
    %cst_48 = arith.constant 1.000000e+00 : f32
    %114 = vector.broadcast %cst_48 : f32 to vector<2x384xf32>
    %115 = arith.addf %114, %113 : vector<2x384xf32>
    %116 = arith.divf %114, %115 : vector<2x384xf32>
    %117 = vector.extract_strided_slice %116 {offsets = [0, 0], sizes = [2, 128], strides = [1, 1]} : vector<2x384xf32> to vector<2x128xf32>
    %118 = vector.extract_strided_slice %116 {offsets = [0, 128], sizes = [2, 128], strides = [1, 1]} : vector<2x384xf32> to vector<2x128xf32>
    %119 = vector.extract_strided_slice %116 {offsets = [0, 256], sizes = [2, 128], strides = [1, 1]} : vector<2x384xf32> to vector<2x128xf32>
    %120 = vector.extract_strided_slice %110 {offsets = [0, 384], sizes = [2, 128], strides = [1, 1]} : vector<2x512xf32> to vector<2x128xf32>
    %121 = math.tanh %120 : vector<2x128xf32>
    %122 = arith.mulf %118, %101 : vector<2x128xf32>
    %123 = arith.mulf %117, %121 : vector<2x128xf32>
    %124 = arith.addf %122, %123 : vector<2x128xf32>
    %125 = math.tanh %124 : vector<2x128xf32>
    %126 = arith.mulf %119, %125 : vector<2x128xf32>
    %c0_49 = arith.constant 0 : index
    %c4_50 = arith.constant 4 : index
    %c0_51 = arith.constant 0 : index
    %127 = vector.load %arg6[%c0_49, %c4_50, %c0_51] : memref<2x8x128xf32, #tpu.memory_space<vmem>>, vector<2x1x128xf32>
    %128 = vector.shape_cast %127 : vector<2x1x128xf32> to vector<2x128xf32>
    %129 = vector.shape_cast %126 : vector<2x128xf32> to vector<2x1x128xf32>
    tpu.vector_store %arg6[%c0_49, %c4_50, %c0_51], %129 {strides = array<i32>} : memref<2x8x128xf32, #tpu.memory_space<vmem>>, vector<2x1x128xf32>,
    %c0_52 = arith.constant 0 : index
    %c5 = arith.constant 5 : index
    %c0_53 = arith.constant 0 : index
    %130 = vector.load %arg11[%c0_52, %c5, %c0_53] : memref<2x8x512xf32, #tpu.memory_space<vmem>>, vector<2x1x512xf32>
    %131 = vector.shape_cast %130 : vector<2x1x512xf32> to vector<2x512xf32>
    %cst_54 = arith.constant dense<0.000000e+00> : vector<2x512xf32>
    %132 = tpu.matmul %126, %12, %cst_54 {dimension_numbers = #tpu.dot_dimension_numbers<[1], [0], [0], [1], [0, 0, 1, 1], [], []>} : vector<2x128xf32>, vector<128x512xf32>, vector<2x512xf32> -> vector<2x512xf32>
    %133 = arith.addf %131, %132 : vector<2x512xf32>
    %134 = vector.extract_strided_slice %133 {offsets = [0, 0], sizes = [2, 384], strides = [1, 1]} : vector<2x512xf32> to vector<2x384xf32>
    %135 = arith.negf %134 : vector<2x384xf32>
    %136 = math.exp %135 : vector<2x384xf32>
    %cst_55 = arith.constant 1.000000e+00 : f32
    %137 = vector.broadcast %cst_55 : f32 to vector<2x384xf32>
    %138 = arith.addf %137, %136 : vector<2x384xf32>
    %139 = arith.divf %137, %138 : vector<2x384xf32>
    %140 = vector.extract_strided_slice %139 {offsets = [0, 0], sizes = [2, 128], strides = [1, 1]} : vector<2x384xf32> to vector<2x128xf32>
    %141 = vector.extract_strided_slice %139 {offsets = [0, 128], sizes = [2, 128], strides = [1, 1]} : vector<2x384xf32> to vector<2x128xf32>
    %142 = vector.extract_strided_slice %139 {offsets = [0, 256], sizes = [2, 128], strides = [1, 1]} : vector<2x384xf32> to vector<2x128xf32>
    %143 = vector.extract_strided_slice %133 {offsets = [0, 384], sizes = [2, 128], strides = [1, 1]} : vector<2x512xf32> to vector<2x128xf32>
    %144 = math.tanh %143 : vector<2x128xf32>
    %145 = arith.mulf %141, %124 : vector<2x128xf32>
    %146 = arith.mulf %140, %144 : vector<2x128xf32>
    %147 = arith.addf %145, %146 : vector<2x128xf32>
    %148 = math.tanh %147 : vector<2x128xf32>
    %149 = arith.mulf %142, %148 : vector<2x128xf32>
    %c0_56 = arith.constant 0 : index
    %c5_57 = arith.constant 5 : index
    %c0_58 = arith.constant 0 : index
    %150 = vector.load %arg6[%c0_56, %c5_57, %c0_58] : memref<2x8x128xf32, #tpu.memory_space<vmem>>, vector<2x1x128xf32>
    %151 = vector.shape_cast %150 : vector<2x1x128xf32> to vector<2x128xf32>
    %152 = vector.shape_cast %149 : vector<2x128xf32> to vector<2x1x128xf32>
    tpu.vector_store %arg6[%c0_56, %c5_57, %c0_58], %152 {strides = array<i32>} : memref<2x8x128xf32, #tpu.memory_space<vmem>>, vector<2x1x128xf32>,
    %c0_59 = arith.constant 0 : index
    %c6 = arith.constant 6 : index
    %c0_60 = arith.constant 0 : index
    %153 = vector.load %arg11[%c0_59, %c6, %c0_60] : memref<2x8x512xf32, #tpu.memory_space<vmem>>, vector<2x1x512xf32>
    %154 = vector.shape_cast %153 : vector<2x1x512xf32> to vector<2x512xf32>
    %cst_61 = arith.constant dense<0.000000e+00> : vector<2x512xf32>
    %155 = tpu.matmul %149, %12, %cst_61 {dimension_numbers = #tpu.dot_dimension_numbers<[1], [0], [0], [1], [0, 0, 1, 1], [], []>} : vector<2x128xf32>, vector<128x512xf32>, vector<2x512xf32> -> vector<2x512xf32>
    %156 = arith.addf %154, %155 : vector<2x512xf32>
    %157 = vector.extract_strided_slice %156 {offsets = [0, 0], sizes = [2, 384], strides = [1, 1]} : vector<2x512xf32> to vector<2x384xf32>
    %158 = arith.negf %157 : vector<2x384xf32>
    %159 = math.exp %158 : vector<2x384xf32>
    %cst_62 = arith.constant 1.000000e+00 : f32
    %160 = vector.broadcast %cst_62 : f32 to vector<2x384xf32>
    %161 = arith.addf %160, %159 : vector<2x384xf32>
    %162 = arith.divf %160, %161 : vector<2x384xf32>
    %163 = vector.extract_strided_slice %162 {offsets = [0, 0], sizes = [2, 128], strides = [1, 1]} : vector<2x384xf32> to vector<2x128xf32>
    %164 = vector.extract_strided_slice %162 {offsets = [0, 128], sizes = [2, 128], strides = [1, 1]} : vector<2x384xf32> to vector<2x128xf32>
    %165 = vector.extract_strided_slice %162 {offsets = [0, 256], sizes = [2, 128], strides = [1, 1]} : vector<2x384xf32> to vector<2x128xf32>
    %166 = vector.extract_strided_slice %156 {offsets = [0, 384], sizes = [2, 128], strides = [1, 1]} : vector<2x512xf32> to vector<2x128xf32>
    %167 = math.tanh %166 : vector<2x128xf32>
    %168 = arith.mulf %164, %147 : vector<2x128xf32>
    %169 = arith.mulf %163, %167 : vector<2x128xf32>
    %170 = arith.addf %168, %169 : vector<2x128xf32>
    %171 = math.tanh %170 : vector<2x128xf32>
    %172 = arith.mulf %165, %171 : vector<2x128xf32>
    %c0_63 = arith.constant 0 : index
    %c6_64 = arith.constant 6 : index
    %c0_65 = arith.constant 0 : index
    %173 = vector.load %arg6[%c0_63, %c6_64, %c0_65] : memref<2x8x128xf32, #tpu.memory_space<vmem>>, vector<2x1x128xf32>
    %174 = vector.shape_cast %173 : vector<2x1x128xf32> to vector<2x128xf32>
    %175 = vector.shape_cast %172 : vector<2x128xf32> to vector<2x1x128xf32>
    tpu.vector_store %arg6[%c0_63, %c6_64, %c0_65], %175 {strides = array<i32>} : memref<2x8x128xf32, #tpu.memory_space<vmem>>, vector<2x1x128xf32>,
    %c0_66 = arith.constant 0 : index
    %c7 = arith.constant 7 : index
    %c0_67 = arith.constant 0 : index
    %176 = vector.load %arg11[%c0_66, %c7, %c0_67] : memref<2x8x512xf32, #tpu.memory_space<vmem>>, vector<2x1x512xf32>
    %177 = vector.shape_cast %176 : vector<2x1x512xf32> to vector<2x512xf32>
    %cst_68 = arith.constant dense<0.000000e+00> : vector<2x512xf32>
    %178 = tpu.matmul %172, %12, %cst_68 {dimension_numbers = #tpu.dot_dimension_numbers<[1], [0], [0], [1], [0, 0, 1, 1], [], []>} : vector<2x128xf32>, vector<128x512xf32>, vector<2x512xf32> -> vector<2x512xf32>
    %179 = arith.addf %177, %178 : vector<2x512xf32>
    %180 = vector.extract_strided_slice %179 {offsets = [0, 0], sizes = [2, 384], strides = [1, 1]} : vector<2x512xf32> to vector<2x384xf32>
    %181 = arith.negf %180 : vector<2x384xf32>
    %182 = math.exp %181 : vector<2x384xf32>
    %cst_69 = arith.constant 1.000000e+00 : f32
    %183 = vector.broadcast %cst_69 : f32 to vector<2x384xf32>
    %184 = arith.addf %183, %182 : vector<2x384xf32>
    %185 = arith.divf %183, %184 : vector<2x384xf32>
    %186 = vector.extract_strided_slice %185 {offsets = [0, 0], sizes = [2, 128], strides = [1, 1]} : vector<2x384xf32> to vector<2x128xf32>
    %187 = vector.extract_strided_slice %185 {offsets = [0, 128], sizes = [2, 128], strides = [1, 1]} : vector<2x384xf32> to vector<2x128xf32>
    %188 = vector.extract_strided_slice %185 {offsets = [0, 256], sizes = [2, 128], strides = [1, 1]} : vector<2x384xf32> to vector<2x128xf32>
    %189 = vector.extract_strided_slice %179 {offsets = [0, 384], sizes = [2, 128], strides = [1, 1]} : vector<2x512xf32> to vector<2x128xf32>
    %190 = math.tanh %189 : vector<2x128xf32>
    %191 = arith.mulf %187, %170 : vector<2x128xf32>
    %192 = arith.mulf %186, %190 : vector<2x128xf32>
    %193 = arith.addf %191, %192 : vector<2x128xf32>
    %194 = math.tanh %193 : vector<2x128xf32>
    %195 = arith.mulf %188, %194 : vector<2x128xf32>
    %c0_70 = arith.constant 0 : index
    %c7_71 = arith.constant 7 : index
    %c0_72 = arith.constant 0 : index
    %196 = vector.load %arg6[%c0_70, %c7_71, %c0_72] : memref<2x8x128xf32, #tpu.memory_space<vmem>>, vector<2x1x128xf32>
    %197 = vector.shape_cast %196 : vector<2x1x128xf32> to vector<2x128xf32>
    %198 = vector.shape_cast %195 : vector<2x128xf32> to vector<2x1x128xf32>
    tpu.vector_store %arg6[%c0_70, %c7_71, %c0_72], %198 {strides = array<i32>} : memref<2x8x128xf32, #tpu.memory_space<vmem>>, vector<2x1x128xf32>,
    %c0_73 = arith.constant 0 : index
    %c0_74 = arith.constant 0 : index
    %199 = vector.load %arg9[%c0_73, %c0_74] : memref<2x128xf32, #tpu.memory_space<vmem>>, vector<2x128xf32>
    tpu.vector_store %arg9[%c0_73, %c0_74], %195 {strides = array<i32>} : memref<2x128xf32, #tpu.memory_space<vmem>>, vector<2x128xf32>,
    %c0_75 = arith.constant 0 : index
    %c0_76 = arith.constant 0 : index
    %200 = vector.load %arg10[%c0_75, %c0_76] : memref<2x128xf32, #tpu.memory_space<vmem>>, vector<2x128xf32>
    tpu.vector_store %arg10[%c0_75, %c0_76], %193 {strides = array<i32>} : memref<2x128xf32, #tpu.memory_space<vmem>>, vector<2x128xf32>,
    %c0_i32_77 = arith.constant 0 : i32
    %201 = arith.cmpi eq, %arg1, %c0_i32_77 : i32
    %202 = arith.extui %201 : i1 to i32
    %c0_i32_78 = arith.constant 0 : i32
    %203 = arith.cmpi ne, %202, %c0_i32_78 : i32
    scf.if %203 {
      %c0_79 = arith.constant 0 : index
      %c0_80 = arith.constant 0 : index
      %c0_81 = arith.constant 0 : index
      %204 = vector.load %arg7[%c0_79, %c0_80, %c0_81] : memref<1x2x128xf32, #tpu.memory_space<vmem>>, vector<1x2x128xf32>
      %205 = vector.shape_cast %204 : vector<1x2x128xf32> to vector<2x128xf32>
      %206 = vector.shape_cast %195 : vector<2x128xf32> to vector<1x2x128xf32>
      tpu.vector_store %arg7[%c0_79, %c0_80, %c0_81], %206 {strides = array<i32>} : memref<1x2x128xf32, #tpu.memory_space<vmem>>, vector<1x2x128xf32>,
      %c0_82 = arith.constant 0 : index
      %c0_83 = arith.constant 0 : index
      %c0_84 = arith.constant 0 : index
      %207 = vector.load %arg8[%c0_82, %c0_83, %c0_84] : memref<1x2x128xf32, #tpu.memory_space<vmem>>, vector<1x2x128xf32>
      %208 = vector.shape_cast %207 : vector<1x2x128xf32> to vector<2x128xf32>
      %209 = vector.shape_cast %193 : vector<2x128xf32> to vector<1x2x128xf32>
      tpu.vector_store %arg8[%c0_82, %c0_83, %c0_84], %209 {strides = array<i32>} : memref<1x2x128xf32, #tpu.memory_space<vmem>>, vector<1x2x128xf32>,
    } else {
    }
    return
  }
  func.func @transform_0(%arg0: i32, %arg1: i32) -> (i32, i32, i32) {
    %c0_i32 = arith.constant 0 : i32
    %c0_i32_0 = arith.constant 0 : i32
    return %arg0, %arg1, %c0_i32 : i32, i32, i32
  }
  func.func @transform_1(%arg0: i32, %arg1: i32) -> (i32, i32) {
    %c0_i32 = arith.constant 0 : i32
    %c0_i32_0 = arith.constant 0 : i32
    %c0_i32_1 = arith.constant 0 : i32
    return %c0_i32, %c0_i32_0 : i32, i32
  }
  func.func @transform_2(%arg0: i32, %arg1: i32) -> (i32, i32) {
    %c0_i32 = arith.constant 0 : i32
    %c0_i32_0 = arith.constant 0 : i32
    %c0_i32_1 = arith.constant 0 : i32
    return %c0_i32, %c0_i32_0 : i32, i32
  }
  func.func @transform_3(%arg0: i32, %arg1: i32) -> (i32, i32) {
    %c0_i32 = arith.constant 0 : i32
    %c0_i32_0 = arith.constant 0 : i32
    %c0_i32_1 = arith.constant 0 : i32
    return %c0_i32, %c0_i32_0 : i32, i32
  }
  func.func @transform_4(%arg0: i32, %arg1: i32) -> (i32, i32, i32) {
    %c0_i32 = arith.constant 0 : i32
    %c0_i32_0 = arith.constant 0 : i32
    return %arg0, %arg1, %c0_i32 : i32, i32, i32
  }
  func.func @transform_5(%arg0: i32, %arg1: i32) -> (i32, i32, i32) {
    %c0_i32 = arith.constant 0 : i32
    %c0_i32_0 = arith.constant 0 : i32
    %c0_i32_1 = arith.constant 0 : i32
    return %c0_i32, %arg0, %c0_i32_0 : i32, i32, i32
  }
  func.func @transform_6(%arg0: i32, %arg1: i32) -> (i32, i32, i32) {
    %c0_i32 = arith.constant 0 : i32
    %c0_i32_0 = arith.constant 0 : i32
    %c0_i32_1 = arith.constant 0 : i32
    return %c0_i32, %arg0, %c0_i32_0 : i32, i32, i32
  }
}

</mosaic_0001>

<bundles_post_ra>
// kernel: input_encoder_forward.1
= control target key start
LH: loop header
LB: loop body
LE: loop exit
PB: predicated region body
PF: predicated region fallthrough
CT: control target
= control target key end

     0   :  { %12 = vsyncpa [#allocation6], 0  ;;  %v2016_v6 = vmov 0.0   ;;  %vm48_vm0 = vcmask 130048   ;;  %s3363_s0 = inlined_call_operand.vmem [shape: f32[2,8,16], index: 0, kind: input, shape index: {}]   ;;  %s3364_s1 = inlined_call_operand.vmem [shape: f32[16,512], index: 1, kind: input, shape index: {}]   ;;  %s3365_s2 = inlined_call_operand.vmem [shape: f32[128,512], index: 2, kind: input, shape index: {}]   ;;  %s3366_s3 = inlined_call_operand.vmem [shape: f32[1,512], index: 3, kind: input, shape index: {}]   ;;  %s3367_s4 = inlined_call_operand.hbm [shape: f32[2,8,128], index: 4, kind: output, shape index: {0}]   ;;  %s3368_s5 = inlined_call_operand.hbm [shape: f32[1,2,128], index: 5, kind: output, shape index: {1}]   ;;  %s3369_s6 = inlined_call_operand.hbm [shape: f32[1,2,128], index: 6, kind: output, shape index: {2}]  }
   0x1   :  { %v36_v0 = vld [vmem:[%s3364_s1 + $0x30] sm:$0xff]  ;;  %v37_v1 = vld [vmem:[%s3364_s1 + $0x38] sm:$0xff]  ;;  %26 = vst [vmem:[#allocation2] sm:$0x3] %v2016_v6  ;;  %v35_v7 = vld [vmem:[%s3364_s1 + $0x28] sm:$0xff] }
   0x2   :  { %v32_v2 = vld [vmem:[%s3364_s1 + $0x10] sm:$0xff]  ;;  %115 = vmatpush.msra.mxu2 %v36_v0  ;;  %138 = vmatpush.msra.mxu3 %v37_v1  ;;  %v33_v3 = vld [vmem:[%s3364_s1 + $0x18] sm:$0xff]  ;;  %27 = vst [vmem:[#allocation3] sm:$0x3] %v2016_v6  ;;  %v34_v10 = vld [vmem:[%s3364_s1 + $0x20] sm:$0xff] }
   0x3   :  { %v2072_v4 = vld [vmem:[%s3365_s2 + $0x1f0] sm:$0xff]  ;;  %v2077_v5 = vld [vmem:[%s3365_s2 + $0x1f8] sm:$0xff]  ;;  %v31_v11 = vld [vmem:[%s3364_s1 + $0x8] sm:$0xff]  ;;  %92 = vmatpush.msra.mxu1 %v35_v7  ;;  %69 = vmatpush.msra.mxu0 %v34_v10 }
   0x4   :  { %116 = vmatpush.msra.mxu2 %v32_v2  ;;  %139 = vmatpush.msra.mxu3 %v33_v3  ;;  %v2085_v8 = vld [vmem:[%s3365_s2 + $0x1d0] sm:$0xff]  ;;  %v2090_v9 = vld [vmem:[%s3365_s2 + $0x1d8] sm:$0xff]  ;;  %v30_v14 = vld [vmem:[%s3364_s1] sm:$0xff] }
   0x5   :  { %v2103_v12 = vld [vmem:[%s3365_s2 + $0x1b0] sm:$0xff]  ;;  %v2108_v13 = vld [vmem:[%s3365_s2 + $0x1b8] sm:$0xff]  ;;  %v2118_v15 = vld [vmem:[%s3365_s2 + $0x1e8] sm:$0xff]  ;;  %93 = vmatpush.msra.mxu1 %v31_v11  ;;  %70 = vmatpush.msra.mxu0 %v30_v14 }
   0x6   :  { %264 = vmatpush.msrb.mxu2 %v2072_v4  ;;  %284 = vmatpush.msrb.mxu3 %v2077_v5  ;;  %v2123_v16 = vld [vmem:[%s3365_s2 + $0x1e0] sm:$0xff]  ;;  %v2128_v17 = vld [vmem:[%s3365_s2 + $0x190] sm:$0xff]  ;;  %v2133_v18 = vld [vmem:[%s3365_s2 + $0x198] sm:$0xff] }
   0x7   :  { %v2140_v19 = vld [vmem:[%s3365_s2 + $0x1c8] sm:$0xff]  ;;  %v2145_v20 = vld [vmem:[%s3365_s2 + $0x1c0] sm:$0xff]  ;;  %244 = vmatpush.msrb.mxu1 %v2118_v15  ;;  %224 = vmatpush.msrb.mxu0 %v2123_v16  ;;  %v2152_v21 = vld [vmem:[%s3365_s2 + $0x170] sm:$0xff] }
   0x8   :  { %265 = vmatpush.msrb.mxu2 %v2085_v8  ;;  %285 = vmatpush.msrb.mxu3 %v2090_v9  ;;  %v2157_v22 = vld [vmem:[%s3365_s2 + $0x178] sm:$0xff]  ;;  %v2164_v23 = vld [vmem:[%s3365_s2 + $0x1a8] sm:$0xff]  ;;  %v2169_v24 = vld [vmem:[%s3365_s2 + $0x1a0] sm:$0xff] }
   0x9   :  { %245 = vmatpush.msrb.mxu1 %v2140_v19  ;;  %225 = vmatpush.msrb.mxu0 %v2145_v20  ;;  %v2176_v25 = vld [vmem:[%s3365_s2 + $0x150] sm:$0xff]  ;;  %v2181_v26 = vld [vmem:[%s3365_s2 + $0x158] sm:$0xff]  ;;  %v2188_v27 = vld [vmem:[%s3365_s2 + $0x188] sm:$0xff] }
   0xa   :  { %266 = vmatpush.msrb.mxu2 %v2103_v12  ;;  %286 = vmatpush.msrb.mxu3 %v2108_v13  ;;  %v2193_v28 = vld [vmem:[%s3365_s2 + $0x180] sm:$0xff]  ;;  %v2200_v29 = vld [vmem:[%s3365_s2 + $0x130] sm:$0xff]  ;;  %v2205_v30 = vld [vmem:[%s3365_s2 + $0x138] sm:$0xff] }
   0xb   :  { %246 = vmatpush.msrb.mxu1 %v2164_v23  ;;  %226 = vmatpush.msrb.mxu0 %v2169_v24  ;;  %v2212_v31 = vld [vmem:[%s3365_s2 + $0x168] sm:$0xff]  ;;  %v28_v32 = vld [vmem:[%s3363_s0] sm:$0xff]  ;;  %v2222_v33 = vld [vmem:[%s3365_s2 + $0x110] sm:$0xff] }
   0xc   :  { %267 = vmatpush.msrb.mxu2 %v2128_v17  ;;  %287 = vmatpush.msrb.mxu3 %v2133_v18  ;;  %v2227_v34 = vld [vmem:[%s3365_s2 + $0x118] sm:$0xff]  ;;  %v2234_v35 = vld [vmem:[%s3365_s2 + $0x160] sm:$0xff]  ;;  %v2241_v36 = vld [vmem:[%s3365_s2 + $0x148] sm:$0xff] }
   0xd   :  { %247 = vmatpush.msrb.mxu1 %v2188_v27  ;;  %227 = vmatpush.msrb.mxu0 %v2193_v28  ;;  %v2246_v37 = vld [vmem:[%s3365_s2 + $0xf0] sm:$0xff]  ;;  %v2253_v38 = vld [vmem:[%s3365_s2 + $0xf8] sm:$0xff]  ;;  %v2258_v39 = vld [vmem:[%s3365_s2 + $0x140] sm:$0xff] }
   0xe   :  { %268 = vmatpush.msrb.mxu2 %v2152_v21  ;;  %288 = vmatpush.msrb.mxu3 %v2157_v22  ;;  %v2265_v40 = vld [vmem:[%s3365_s2 + $0x128] sm:$0xff]  ;;  %v2270_v41 = vld [vmem:[%s3365_s2 + $0xd0] sm:$0xff]  ;;  %v2277_v42 = vld [vmem:[%s3365_s2 + $0xd8] sm:$0xff] }
   0xf   :  { %248 = vmatpush.msrb.mxu1 %v2212_v31  ;;  %1722 = vmatmul.msk.f32.vlgmr.msra.gmra.mxu2 %vm48_vm0, %v28_v32  ;;  %3467 = vst [vmem:[#allocation12_spill] sm:$0xff] %v2270_v41  ;;  %v2282_v43 = vld [vmem:[%s3365_s2 + $0x120] sm:$0xff]  ;;  %v2289_v44 = vld [vmem:[%s3365_s2 + $0x108] sm:$0xff]  ;;  %v2294_v45 = vld [vmem:[%s3365_s2 + $0xb0] sm:$0xff] }
  0x10   :  { %269 = vmatpush.msrb.mxu2 %v2176_v25  ;;  %289 = vmatpush.msrb.mxu3 %v2181_v26  ;;  %3468 = vst [vmem:[#allocation13_spill] sm:$0xff] %v2277_v42  ;;  %v2301_v46 = vld [vmem:[%s3365_s2 + $0xb8] sm:$0xff]  ;;  %v2308_v47 = vld [vmem:[%s3365_s2 + $0x100] sm:$0xff]  ;;  %v2315_v48 = vld [vmem:[%s3365_s2 + $0xe8] sm:$0xff] }
  0x11   :  { %1724 = vmatmul.msk.f32.vlgmr.msra.gmra.mxu3 %vm48_vm0, %v28_v32  ;;  %228 = vmatpush.msrb.mxu0 %v2234_v35  ;;  %3469 = vst [vmem:[#allocation14_spill] sm:$0xff] %v2294_v45  ;;  %v2320_v49 = vld [vmem:[%s3365_s2 + $0x90] sm:$0xff]  ;;  %v2327_v50 = vld [vmem:[%s3365_s2 + $0x98] sm:$0xff]  ;;  %v29_v51 = vld [vmem:[%s3363_s0 + $0x8] sm:$0xff] }
  0x12   :  { %270 = vmatpush.msrb.mxu2 %v2200_v29  ;;  %290 = vmatpush.msrb.mxu3 %v2205_v30  ;;  %3470 = vst [vmem:[#allocation15_spill] sm:$0xff] %v2301_v46 }
  0x13   :  { %249 = vmatpush.msrb.mxu1 %v2241_v36  ;;  %229 = vmatpush.msrb.mxu0 %v2258_v39  ;;  %3471 = vst [vmem:[#allocation16_spill] sm:$0xff] %v2320_v49 }
  0x14   :  { %271 = vmatpush.msrb.mxu2 %v2222_v33  ;;  %291 = vmatpush.msrb.mxu3 %v2227_v34  ;;  %3472 = vst [vmem:[#allocation17_spill] sm:$0xff] %v2327_v50 }
  0x15   :  { %250 = vmatpush.msrb.mxu1 %v2265_v40  ;;  %230 = vmatpush.msrb.mxu0 %v2282_v43 }
  0x16   :  { %272 = vmatpush.msrb.mxu2 %v2246_v37  ;;  %292 = vmatpush.msrb.mxu3 %v2253_v38 }
  0x17   :  { %251 = vmatpush.msrb.mxu1 %v2289_v44  ;;  %1718 = vmatmul.msk.f32.vlgmr.msra.gmra.mxu0 %vm48_vm0, %v28_v32 }
  0x18   :  { %273 = vmatpush.msrb.mxu2 %v2270_v41  ;;  %293 = vmatpush.msrb.mxu3 %v2277_v42 }
  0x1a   :  { %274 = vmatpush.msrb.mxu2 %v2294_v45  ;;  %294 = vmatpush.msrb.mxu3 %v2301_v46 }
  0x1b   :  { %13 = vsyncpa [#allocation8], 0  ;;  %1720 = vmatmul.msk.f32.vlgmr.msra.gmra.mxu1 %vm48_vm0, %v28_v32  ;;  %231 = vmatpush.msrb.mxu0 %v2308_v47  ;;  %v2337_v52 = vld [vmem:[%s3365_s2 + $0xe0] sm:$0xff]  ;;  %v2344_v53 = vld [vmem:[%s3365_s2 + $0xc8] sm:$0xff]  ;;  %vm313_vm1 = vcmask 1042434   ;;  %vm319_vm2 = vcmask 1043459  }
  0x1c   :  { %252 = vmatpush.msrb.mxu1 %v2315_v48  ;;  %275 = vmatpush.msrb.mxu2 %v2320_v49  ;;  %v2349_v54 = vld [vmem:[%s3365_s2 + $0x70] sm:$0xff]  ;;  %v2356_v55 = vld [vmem:[%s3365_s2 + $0x78] sm:$0xff]  ;;  %v2361_v56 = vld [vmem:[%s3365_s2 + $0xc0] sm:$0xff]  ;;  %vm311_vm3 = vcmask 1040384   ;;  %vm317_vm4 = vcmask 1041409   ;;  %vm315_vm5 = vcmask 1041408  }
  0x1d   :  { %3473 = vst [vmem:[#allocation18_spill] sm:$0xff] %v2349_v54  ;;  %295 = vmatpush.msrb.mxu3 %v2327_v50  ;;  %1723 = vmatmul.msk.f32.gmra.mxu2 %vm48_vm0, %v29_v51  ;;  %v2368_v57 = vld [vmem:[%s3365_s2 + $0xa8] sm:$0xff]  ;;  %v2373_v58 = vld [vmem:[%s3365_s2 + $0x50] sm:$0xff]  ;;  %v2380_v59 = vld [vmem:[%s3365_s2 + $0x58] sm:$0xff]  ;;  %vm321_vm6 = vcmask 1042433   ;;  %s1675_s16 = sshll.u32 %s3367_s4, 4  ;;  %s1676_s16 = int_to_ptr.hbm [resolvable:$true] %s1675_s16 }
  0x1e   :  { %3474 = vst [vmem:[#allocation19_spill] sm:$0xff] %v2356_v55  ;;  %1725 = vmatmul.msk.f32.gmra.mxu3 %vm48_vm0, %v29_v51  ;;  %232 = vmatpush.msrb.mxu0 %v2337_v52  ;;  %v2385_v60 = vld [vmem:[%s3365_s2 + $0xa0] sm:$0xff]  ;;  %v2392_v61 = vld [vmem:[%s3365_s2 + $0x88] sm:$0xff]  ;;  %v2397_v62 = vld [vmem:[%s3365_s2 + $0x30] sm:$0xff]  ;;  %s2018_s17 = smov 128   ;;  %s2019_s18 = smov 8  }
  0x1f   :  { %3475 = vst [vmem:[#allocation20_spill] sm:$0xff] %v2368_v57  ;;  %253 = vmatpush.msrb.mxu1 %v2344_v53  ;;  %276 = vmatpush.msrb.mxu2 %v2349_v54  ;;  %v2404_v63 = vld [vmem:[%s3365_s2 + $0x38] sm:$0xff]  ;;  %v2411_v0 = vld [vmem:[%s3365_s2 + $0x80] sm:$0xff]  ;;  %v2418_v1 = vld [vmem:[%s3365_s2 + $0x68] sm:$0xff]  ;;  %s2020_s4 = smov [#allocation7]   ;;  %s1689_s21 = sshll.u32 %s3368_s5, 4  ;;  %s1690_s21 = int_to_ptr.hbm [resolvable:$true] %s1689_s21 }
  0x20   :  { %3476 = vst [vmem:[#allocation21_spill] sm:$0xff] %v2373_v58  ;;  %296 = vmatpush.msrb.mxu3 %v2356_v55  ;;  %233 = vmatpush.msrb.mxu0 %v2361_v56  ;;  %v2423_v2 = vld [vmem:[%s3365_s2 + $0x10] sm:$0xff]  ;;  %v2430_v3 = vld [vmem:[%s3365_s2 + $0x18] sm:$0xff]  ;;  %v219_v6 = vld [vmem:[#allocation2] sm:$0x3]  ;;  %s1687_s19 = sshll.u32 %s2020_s4, 4  ;;  %s1688_s19 = int_to_ptr.vmem [resolvable:$true] %s1687_s19 }
  0x21   :  { %3477 = vst [vmem:[#allocation22_spill] sm:$0xff] %v2380_v59  ;;  %254 = vmatpush.msrb.mxu1 %v2368_v57  ;;  %277 = vmatpush.msrb.mxu2 %v2373_v58  ;;  %v2437_v7 = vld [vmem:[%s3365_s2 + $0x60] sm:$0xff]  ;;  %v2444_v10 = vld [vmem:[%s3365_s2 + $0x48] sm:$0xff]  ;;  %s2021_s22 = smov [#allocation9]   ;;  %s1700_s26 = sshll.u32 %s3369_s6, 4  ;;  %s1701_s26 = int_to_ptr.hbm [resolvable:$true] %s1700_s26 }
  0x22   :  { %3478 = vst [vmem:[#allocation23_spill] sm:$0xff] %v2385_v60  ;;  %297 = vmatpush.msrb.mxu3 %v2380_v59  ;;  %234 = vmatpush.msrb.mxu0 %v2385_v60  ;;  %v2450_v11 = vld [vmem:[%s3365_s2 + $0x40] sm:$0xff]  ;;  %v2456_v14 = vld [vmem:[%s3365_s2 + $0x28] sm:$0xff]  ;;  %s1698_s23 = sshll.u32 %s2021_s22, 4  ;;  %s1699_s23 = int_to_ptr.vmem [resolvable:$true] %s1698_s23 }
  0x23   :  { %3479 = vst [vmem:[#allocation24_spill] sm:$0xff] %v2392_v61  ;;  %255 = vmatpush.msrb.mxu1 %v2392_v61  ;;  %278 = vmatpush.msrb.mxu2 %v2397_v62  ;;  %v2462_v32 = vld [vmem:[%s3365_s2 + $0x20] sm:$0xff] }
  0x24   :  { %3480 = vst [vmem:[#allocation25_spill] sm:$0xff] %v2397_v62  ;;  %298 = vmatpush.msrb.mxu3 %v2404_v63  ;;  %1719 = vmatmul.msk.f32.gmra.mxu0 %vm48_vm0, %v29_v51 }
  0x25   :  { %3481 = vst [vmem:[#allocation26_spill] sm:$0xff] %v2404_v63  ;;  %1721 = vmatmul.msk.f32.gmra.mxu1 %vm48_vm0, %v29_v51  ;;  %235 = vmatpush.msrb.mxu0 %v2411_v0  ;;  %v2469_v51 = vld [vmem:[%s3365_s2 + $0x8] sm:$0xff] }
  0x26   :  { %3482 = vst [vmem:[#allocation27_spill] sm:$0xff] %v2411_v0  ;;  %256 = vmatpush.msrb.mxu1 %v2418_v1  ;;  %279 = vmatpush.msrb.mxu2 %v2423_v2 }
  0x27   :  { %3483 = vst [vmem:[#allocation28_spill] sm:$0xff] %v2418_v1  ;;  %299 = vmatpush.msrb.mxu3 %v2430_v3  ;;  %280 = vmatmul.f32.vlgmr.msrb.gmra.mxu2 %v219_v6 }
  0x28   :  { %3484 = vst [vmem:[#allocation29_spill] sm:$0xff] %v2423_v2  ;;  %300 = vmatmul.f32.vlgmr.msrb.gmra.mxu3 %v219_v6  ;;  %236 = vmatpush.msrb.mxu0 %v2437_v7 }
  0x29   :  { %3485 = vst [vmem:[#allocation30_spill] sm:$0xff] %v2430_v3  ;;  %257 = vmatpush.msrb.mxu1 %v2444_v10  ;;  %450 = vmatpush.msra.mxu2 %v2072_v4  ;;  %v2476_v3 = vld [vmem:[%s3365_s2] sm:$0xff] }
  0x2a   :  { %3486 = vst [vmem:[#allocation31_spill] sm:$0xff] %v2437_v7  ;;  %237 = vmatpush.msrb.mxu0 %v2450_v11  ;;  %470 = vmatpush.msra.mxu3 %v2077_v5 }
  0x2b   :  { %3487 = vst [vmem:[#allocation32_spill] sm:$0xff] %v2444_v10  ;;  %258 = vmatpush.msrb.mxu1 %v2456_v14  ;;  %451 = vmatpush.msra.mxu2 %v2085_v8 }
  0x2c   :  { %3488 = vst [vmem:[#allocation33_spill] sm:$0xff] %v2450_v11  ;;  %238 = vmatpush.msrb.mxu0 %v2462_v32  ;;  %471 = vmatpush.msra.mxu3 %v2090_v9 }
  0x2d   :  { %3489 = vst [vmem:[#allocation34_spill] sm:$0xff] %v2456_v14  ;;  %259 = vmatpush.msrb.mxu1 %v2469_v51  ;;  %452 = vmatpush.msra.mxu2 %v2103_v12 }
  0x2e   :  { %3490 = vst [vmem:[#allocation35_spill] sm:$0xff] %v2462_v32  ;;  %260 = vmatmul.f32.vlgmr.msrb.gmra.mxu1 %v219_v6  ;;  %239 = vmatpush.msrb.mxu0 %v2476_v3 }
  0x2f   :  { %3491 = vst [vmem:[#allocation36_spill] sm:$0xff] %v2469_v51  ;;  %240 = vmatmul.f32.vlgmr.msrb.gmra.mxu0 %v219_v6  ;;  %430 = vmatpush.msra.mxu1 %v2118_v15 }
  0x30   :  { %3492 = vst [vmem:[#allocation37_spill] sm:$0xff] %v2476_v3  ;;  %410 = vmatpush.msra.mxu0 %v2123_v16  ;;  %472 = vmatpush.msra.mxu3 %v2108_v13  ;;  %v3493_v6 = vld [vmem:[#allocation30_spill] sm:$0xff] }
  0x31   :  { %431 = vmatpush.msra.mxu1 %v2140_v19  ;;  %453 = vmatpush.msra.mxu2 %v2128_v17 }
  0x32   :  { %411 = vmatpush.msra.mxu0 %v2145_v20  ;;  %473 = vmatpush.msra.mxu3 %v2133_v18 }
  0x33   :  { %432 = vmatpush.msra.mxu1 %v2164_v23  ;;  %454 = vmatpush.msra.mxu2 %v2152_v21 }
  0x34   :  { %412 = vmatpush.msra.mxu0 %v2169_v24  ;;  %474 = vmatpush.msra.mxu3 %v2157_v22 }
  0x35   :  { %433 = vmatpush.msra.mxu1 %v2188_v27  ;;  %455 = vmatpush.msra.mxu2 %v2176_v25 }
  0x36   :  { %413 = vmatpush.msra.mxu0 %v2193_v28  ;;  %475 = vmatpush.msra.mxu3 %v2181_v26 }
  0x37   :  { %434 = vmatpush.msra.mxu1 %v2212_v31  ;;  %456 = vmatpush.msra.mxu2 %v2200_v29 }
  0x38   :  { %414 = vmatpush.msra.mxu0 %v2234_v35  ;;  %476 = vmatpush.msra.mxu3 %v2205_v30 }
  0x39   :  { %435 = vmatpush.msra.mxu1 %v2241_v36  ;;  %457 = vmatpush.msra.mxu2 %v2222_v33 }
  0x3a   :  { %415 = vmatpush.msra.mxu0 %v2258_v39  ;;  %477 = vmatpush.msra.mxu3 %v2227_v34 }
  0x3b   :  { %436 = vmatpush.msra.mxu1 %v2265_v40  ;;  %458 = vmatpush.msra.mxu2 %v2246_v37 }
  0x3c   :  { %416 = vmatpush.msra.mxu0 %v2282_v43  ;;  %478 = vmatpush.msra.mxu3 %v2253_v38 }
  0x3d   :  { %437 = vmatpush.msra.mxu1 %v2289_v44  ;;  %459 = vmatpush.msra.mxu2 %v2270_v41 }
  0x3e   :  { %417 = vmatpush.msra.mxu0 %v2308_v47  ;;  %479 = vmatpush.msra.mxu3 %v2277_v42 }
  0x3f   :  { %438 = vmatpush.msra.mxu1 %v2315_v48  ;;  %460 = vmatpush.msra.mxu2 %v2294_v45 }
  0x40   :  { %418 = vmatpush.msra.mxu0 %v2337_v52  ;;  %480 = vmatpush.msra.mxu3 %v2301_v46 }
  0x41   :  { %439 = vmatpush.msra.mxu1 %v2344_v53  ;;  %461 = vmatpush.msra.mxu2 %v2320_v49 }
  0x42   :  { %419 = vmatpush.msra.mxu0 %v2361_v56  ;;  %481 = vmatpush.msra.mxu3 %v2327_v50 }
  0x43   :  { %440 = vmatpush.msra.mxu1 %v2368_v57  ;;  %462 = vmatpush.msra.mxu2 %v2349_v54 }
  0x44   :  { %420 = vmatpush.msra.mxu0 %v2385_v60  ;;  %482 = vmatpush.msra.mxu3 %v2356_v55 }
  0x45   :  { %441 = vmatpush.msra.mxu1 %v2392_v61  ;;  %463 = vmatpush.msra.mxu2 %v2373_v58 }
  0x46   :  { %421 = vmatpush.msra.mxu0 %v2411_v0  ;;  %483 = vmatpush.msra.mxu3 %v2380_v59 }
  0x47   :  { %442 = vmatpush.msra.mxu1 %v2418_v1  ;;  %464 = vmatpush.msra.mxu2 %v2397_v62 }
  0x48   :  { %422 = vmatpush.msra.mxu0 %v2437_v7  ;;  %484 = vmatpush.msra.mxu3 %v2404_v63 }
  0x49   :  { %443 = vmatpush.msra.mxu1 %v2444_v10  ;;  %465 = vmatpush.msra.mxu2 %v2423_v2 }
  0x4a   :  { %423 = vmatpush.msra.mxu0 %v2450_v11  ;;  %485 = vmatpush.msra.mxu3 %v3493_v6 }
  0x4b   :  { %444 = vmatpush.msra.mxu1 %v2456_v14  ;;  %627 = vmatpush.msrb.mxu2 %v2072_v4 }
  0x4c   :  { %424 = vmatpush.msra.mxu0 %v2462_v32  ;;  %647 = vmatpush.msrb.mxu3 %v2077_v5 }
  0x4d   :  { %445 = vmatpush.msra.mxu1 %v2469_v51  ;;  %628 = vmatpush.msrb.mxu2 %v2085_v8 }
  0x4e   :  { %425 = vmatpush.msra.mxu0 %v2476_v3  ;;  %648 = vmatpush.msrb.mxu3 %v2090_v9 }
  0x4f   :  { %607 = vmatpush.msrb.mxu1 %v2118_v15  ;;  %629 = vmatpush.msrb.mxu2 %v2103_v12 }
  0x50   :  { %587 = vmatpush.msrb.mxu0 %v2123_v16  ;;  %649 = vmatpush.msrb.mxu3 %v2108_v13 }
  0x51   :  { %608 = vmatpush.msrb.mxu1 %v2140_v19  ;;  %630 = vmatpush.msrb.mxu2 %v2128_v17 }
  0x52   :  { %588 = vmatpush.msrb.mxu0 %v2145_v20  ;;  %650 = vmatpush.msrb.mxu3 %v2133_v18 }
  0x53   :  { %609 = vmatpush.msrb.mxu1 %v2164_v23  ;;  %631 = vmatpush.msrb.mxu2 %v2152_v21 }
  0x54   :  { %589 = vmatpush.msrb.mxu0 %v2169_v24  ;;  %651 = vmatpush.msrb.mxu3 %v2157_v22 }
  0x55   :  { %610 = vmatpush.msrb.mxu1 %v2188_v27  ;;  %632 = vmatpush.msrb.mxu2 %v2176_v25 }
  0x56   :  { %590 = vmatpush.msrb.mxu0 %v2193_v28  ;;  %652 = vmatpush.msrb.mxu3 %v2181_v26 }
  0x57   :  { %611 = vmatpush.msrb.mxu1 %v2212_v31  ;;  %633 = vmatpush.msrb.mxu2 %v2200_v29 }
  0x58   :  { %591 = vmatpush.msrb.mxu0 %v2234_v35  ;;  %653 = vmatpush.msrb.mxu3 %v2205_v30 }
  0x59   :  { %612 = vmatpush.msrb.mxu1 %v2241_v36  ;;  %634 = vmatpush.msrb.mxu2 %v2222_v33 }
  0x5a   :  { %592 = vmatpush.msrb.mxu0 %v2258_v39  ;;  %654 = vmatpush.msrb.mxu3 %v2227_v34 }
  0x5b   :  { %613 = vmatpush.msrb.mxu1 %v2265_v40  ;;  %635 = vmatpush.msrb.mxu2 %v2246_v37 }
  0x5c   :  { %593 = vmatpush.msrb.mxu0 %v2282_v43  ;;  %655 = vmatpush.msrb.mxu3 %v2253_v38 }
  0x5d   :  { %614 = vmatpush.msrb.mxu1 %v2289_v44  ;;  %636 = vmatpush.msrb.mxu2 %v2270_v41 }
  0x5e   :  { %594 = vmatpush.msrb.mxu0 %v2308_v47  ;;  %656 = vmatpush.msrb.mxu3 %v2277_v42 }
  0x5f   :  { %615 = vmatpush.msrb.mxu1 %v2315_v48  ;;  %637 = vmatpush.msrb.mxu2 %v2294_v45 }
  0x60   :  { %595 = vmatpush.msrb.mxu0 %v2337_v52  ;;  %657 = vmatpush.msrb.mxu3 %v2301_v46 }
  0x61   :  { %616 = vmatpush.msrb.mxu1 %v2344_v53  ;;  %638 = vmatpush.msrb.mxu2 %v2320_v49 }
  0x62   :  { %596 = vmatpush.msrb.mxu0 %v2361_v56  ;;  %658 = vmatpush.msrb.mxu3 %v2327_v50 }
  0x63   :  { %617 = vmatpush.msrb.mxu1 %v2368_v57  ;;  %639 = vmatpush.msrb.mxu2 %v2349_v54 }
  0x64   :  { %597 = vmatpush.msrb.mxu0 %v2385_v60  ;;  %659 = vmatpush.msrb.mxu3 %v2356_v55 }
  0x65   :  { %618 = vmatpush.msrb.mxu1 %v2392_v61  ;;  %640 = vmatpush.msrb.mxu2 %v2373_v58 }
  0x66   :  { %598 = vmatpush.msrb.mxu0 %v2411_v0  ;;  %660 = vmatpush.msrb.mxu3 %v2380_v59 }
  0x67   :  { %619 = vmatpush.msrb.mxu1 %v2418_v1  ;;  %641 = vmatpush.msrb.mxu2 %v2397_v62  ;;  %v38_v62 = vld [vmem:[%s3366_s3] sm:$0xf] }
  0x68   :  { %599 = vmatpush.msrb.mxu0 %v2437_v7  ;;  %661 = vmatpush.msrb.mxu3 %v2404_v63  ;;  %v42_v59 = vperm.slane %v38_v62, 2  ;;  %v40_v58 = vperm.slane %v38_v62, 0  ;;  %v41_v63 = vperm.slane %v38_v62, 1 }
  0x69   :  { %620 = vmatpush.msrb.mxu1 %v2444_v10  ;;  %642 = vmatpush.msrb.mxu2 %v2423_v2  ;;  %v43_v10 = vperm.slane %v38_v62, 3 }
  0x6a   :  { %600 = vmatpush.msrb.mxu0 %v2450_v11  ;;  %662 = vmatpush.msrb.mxu3 %v3493_v6 }
  0x6b   :  { %621 = vmatpush.msrb.mxu1 %v2456_v14 }
  0x6c   :  { %601 = vmatpush.msrb.mxu0 %v2462_v32 }
  0x6d   :  { %622 = vmatpush.msrb.mxu1 %v2469_v51 }
  0x6e   :  { %602 = vmatpush.msrb.mxu0 %v2476_v3 }
  0x92   :  { %v118_v11 = vpop.f32.mrf.mxu2 }
  0x93   :  { %v119_v14 = vadd.f32 %v118_v11, %v42_v59 }
  0x94   :  { %v72_v55 = vpop.f32.mrf.mxu0  ;;  %v141_v2 = vpop.f32.mrf.mxu3 }
  0x95   :  { %v73_v54 = vadd.f32 %v72_v55, %v40_v58  ;;  %149 = vst [vmem:[#allocation4 + $0x10] sm:$0xff] %v119_v14  ;;  %v142_v6 = vadd.f32 %v141_v2, %v43_v10 }
  0x97   :  { %147 = vst [vmem:[#allocation4] sm:$0xff] %v73_v54 }
  0x98   :  { %v95_v32 = vpop.f32.mrf.mxu1  ;;  %150 = vst [vmem:[#allocation4 + $0x18] sm:$0xff] %v142_v6 }
  0x99   :  { %v96_v1 = vadd.f32 %v95_v32, %v41_v63 }
  0x9b   :  { %148 = vst [vmem:[#allocation4 + $0x8] sm:$0xff] %v96_v1 }
  0xa0   :  { %v121_v51 = vpop.f32.mrf.mxu2 }
  0xa1   :  { %v75_v3 = vpop.f32.mrf.mxu0  ;;  %v122_v7 = vadd.f32 %v121_v51, %v42_v59  ;;  %v144_v50 = vpop.f32.mrf.mxu3 }
  0xa2   :  { %v76_v49 = vadd.f32 %v75_v3, %v40_v58  ;;  %v98_v61 = vpop.f32.mrf.mxu1  ;;  %v145_v0 = vadd.f32 %v144_v50, %v43_v10 }
  0xa3   :  { %v99_v62 = vadd.f32 %v98_v61, %v41_v63  ;;  %153 = vst [vmem:[#allocation4 + $0x30] sm:$0xff] %v122_v7  ;;  %v221_v63 = vld [vmem:[#allocation4] ss:$8 sm:$0xf] }
  0xa4   :  { %151 = vst [vmem:[#allocation4 + $0x20] sm:$0xff] %v76_v49 }
  0xa5   :  { %152 = vst [vmem:[#allocation4 + $0x28] sm:$0xff] %v99_v62 }
  0xa6   :  { %154 = vst [vmem:[#allocation4 + $0x38] sm:$0xff] %v145_v0 }
  0xaa   :  { %v281_v55 = vpop.f32.mrf.mxu2 }
  0xab   :  { %v261_v11 = vpop.f32.mrf.mxu1  ;;  %v309_v2 = vrot.slane %v281_v55, 6  ;;  %v301_v14 = vpop.f32.mrf.mxu3 }
  0xac   :  { %v308_v54 = vrot.slane %v261_v11, 7  ;;  %v310_v1 = vrot.slane %v301_v14, 5  ;;  %v241_v59 = vpop.f32.mrf.mxu0 }
  0xad   :  { %v223_v32 = vld [vmem:[#allocation4 + $0x20] ss:$8 sm:$0xf] }
  0xae   :  { %v314_v50 = vsel %vm313_vm1, %v309_v2, %v310_v1  ;;  %v320_v58 = vsel %vm319_vm2, %v309_v2, %v310_v1  ;;  %v312_v49 = vsel %vm311_vm3, %v241_v59, %v308_v54  ;;  %v318_v61 = vsel %vm317_vm4, %v241_v59, %v308_v54 }
  0xaf   :  { %v316_v0 = vsel %vm315_vm5, %v312_v49, %v314_v50  ;;  %v322_v3 = vsel %vm321_vm6, %v318_v61, %v320_v58 }
  0xb0   :  { %v323_v7 = vrot.slane %v322_v3, 1  ;;  %v326_v10 = vadd.f32 %v316_v0, %v221_v63 }
  0xb2   :  { %v327_v51 = vadd.f32 %v323_v7, %v223_v32  ;;  %v1726_v6 = vmul.f32 -1.442695, %v326_v10  ;;  %v368_v50 = vrot.slane %v326_v10, 3 }
  0xb4   :  { %1748 = vpow2.f32 %v1726_v6  ;;  %v1727_v62 = vmul.f32 -1.442695, %v327_v51  ;;  %v369_v63 = vrot.slane %v327_v51, 3 }
  0xb6   :  { %1750 = vpow2.f32 %v1727_v62 }
  0xba   :  { %v1749_v55 = vpop.eup %1748 }
  0xbb   :  { %v334_v11 = vadd.f32 1.0, %v1749_v55 }
  0xbc   :  { %v1751_v2 = vpop.eup %1750 }
  0xbd   :  { %v335_v14 = vadd.f32 1.0, %v1751_v2  ;;  %1752 = vrcp.f32 %v334_v11  ;;  %v347_v61 = vand.u32 2147483648, %v334_v11  ;;  %v345_v3 = vand.u32 2147483647, %v334_v11  ;;  %v220_v2 = vld [vmem:[#allocation3] sm:$0x3] }
  0xbe   :  { %vm341_vm8 = vweird.f32 %v334_v11 }
  0xbf   :  { %1754 = vrcp.f32 %v335_v14  ;;  %v362_v32 = vand.u32 2147483648, %v335_v14  ;;  %v360_v55 = vand.u32 2147483647, %v335_v14  ;;  %v348_v46 = vor.u32 1.1754944e-38, %v347_v61 }
  0xc0   :  { %1756 = vtanh.f32 %v368_v50  ;;  %vm346_vm11 = vcmp.eq.f32.partialorder %v345_v3, 8.507059e+37  ;;  %vm356_vm12 = vweird.f32 %v335_v14 }
  0xc1   :  { %1758 = vtanh.f32 %v369_v63  ;;  %vm361_vm14 = vcmp.eq.f32.partialorder %v360_v55, 8.507059e+37 }
  0xc3   :  { %v1753_v54 = vpop.eup %1752 }
  0xc4   :  { %v337_v1 = vmul.f32 %v1753_v54, %v334_v11  ;;  %vm342_vm7 = vweird.f32 %v1753_v54 }
  0xc5   :  { %v1755_v59 = vpop.eup %1754  ;;  %vm343_vm10 = vmor %vm341_vm8, %vm342_vm7 }
  0xc6   :  { %v338_v49 = vsub.f32 1.0, %v337_v1  ;;  %v352_v58 = vmul.f32 %v1755_v59, %v335_v14  ;;  %vm357_vm9 = vweird.f32 %v1755_v59  ;;  %v1757_v50 = vpop.eup %1756 }
  0xc7   :  { %vm358_vm13 = vmor %vm356_vm12, %vm357_vm9  ;;  %v1759_v42 = vpop.eup %1758 }
  0xc8   :  { %v339_v0 = vmul.f32 %v1753_v54, %v338_v49  ;;  %v353_v7 = vsub.f32 1.0, %v352_v58  ;;  %v363_v49 = vor.u32 1.1754944e-38, %v362_v32  ;;  %v381_v58 = vrot.slane %v220_v2, 1 }
  0xca   :  { %v340_v6 = vadd.f32 %v1753_v54, %v339_v0  ;;  %v354_v62 = vmul.f32 %v1755_v59, %v353_v7 }
  0xcc   :  { %v344_v10 = vsel %vm343_vm10, %v1753_v54, %v340_v6  ;;  %v355_v1 = vadd.f32 %v1755_v59, %v354_v62 }
  0xcd   :  { %v349_v51 = vsel %vm346_vm11, %v348_v46, %v344_v10  ;;  %v400_v10 = vld [vmem:[#allocation4 + $0x1] ss:$8 sm:$0xf] }
  0xce   :  { %v359_v45 = vsel %vm358_vm13, %v1755_v59, %v355_v1  ;;  %v376_v11 = vrot.slane %v349_v51, 1  ;;  %v385_v60 = vmul.f32 %v1757_v50, %v349_v51  ;;  %v391_v46 = vrot.slane %v349_v51, 2 }
  0xcf   :  { %v364_v0 = vsel %vm361_vm14, %v363_v49, %v359_v45 }
  0xd0   :  { %v377_v7 = vrot.slane %v364_v0, 1  ;;  %v383_v57 = vmul.f32 %v376_v11, %v220_v2  ;;  %v386_v61 = vmul.f32 %v1759_v42, %v364_v0  ;;  %v392_v59 = vrot.slane %v364_v0, 2 }
  0xd2   :  { %v384_v41 = vmul.f32 %v381_v58, %v377_v7  ;;  %v2616_v63 = vadd.f32 %v385_v60, %v383_v57  ;;  %v402_v58 = vld [vmem:[#allocation4 + $0x21] ss:$8 sm:$0xf] }
  0xd4   :  { %v2618_v54 = vadd.f32 %v386_v61, %v384_v41  ;;  %1760 = vtanh.f32 %v2616_v63 }
  0xd6   :  { %1762 = vtanh.f32 %v2618_v54 }
  0xda   :  { %v1761_v14 = vpop.eup %1760 }
  0xdb   :  { %v395_v3 = vmul.f32 %v1761_v14, %v391_v46 }
  0xdc   :  { %v1763_v32 = vpop.eup %1762 }
  0xdd   :  { %v396_v45 = vmul.f32 %v1763_v32, %v392_v59  ;;  %397 = vst [vmem:[#allocation5] sm:$0x1] %v395_v3 }
  0xde   :  { %405 = vst [vmem:[#allocation1] ss:$9 sm:$0xff] %v395_v3 }
  0xdf   :  { %398 = vst [vmem:[#allocation5 + $0x8] sm:$0x1] %v396_v45 }
  0xe0   :  { %407 = vst [vmem:[#allocation1 + $0x1] ss:$9 sm:$0xff] %v396_v45 }
  0xe7   :  { %v408_v6 = vld [vmem:[#allocation1] sm:$0xff] }
  0xe8   :  { %426 = vmatmul.f32.vlgmr.msra.gmra.mxu0 %v408_v6  ;;  %446 = vmatmul.f32.vlgmr.msra.gmra.mxu1 %v408_v6 }
  0xe9   :  { %466 = vmatmul.f32.vlgmr.msra.gmra.mxu2 %v408_v6  ;;  %486 = vmatmul.f32.vlgmr.msra.gmra.mxu3 %v408_v6 }
  0xea   :  { %764 = vmatpush.msra.mxu0 %v2123_v16  ;;  %784 = vmatpush.msra.mxu1 %v2118_v15  ;;  %v3500_v15 = vld [vmem:[#allocation27_spill] sm:$0xff]  ;;  %v3501_v16 = vld [vmem:[#allocation24_spill] sm:$0xff] }
  0xeb   :  { %804 = vmatpush.msra.mxu2 %v2072_v4  ;;  %824 = vmatpush.msra.mxu3 %v2077_v5  ;;  %v3494_v4 = vld [vmem:[#allocation12_spill] sm:$0xff]  ;;  %v3495_v5 = vld [vmem:[#allocation13_spill] sm:$0xff] }
  0xec   :  { %765 = vmatpush.msra.mxu0 %v2145_v20  ;;  %785 = vmatpush.msra.mxu1 %v2140_v19  ;;  %v3504_v19 = vld [vmem:[#allocation31_spill] sm:$0xff]  ;;  %v3505_v20 = vld [vmem:[#allocation28_spill] sm:$0xff] }
  0xed   :  { %805 = vmatpush.msra.mxu2 %v2085_v8  ;;  %825 = vmatpush.msra.mxu3 %v2090_v9  ;;  %v3496_v8 = vld [vmem:[#allocation23_spill] sm:$0xff]  ;;  %v3497_v9 = vld [vmem:[#allocation20_spill] sm:$0xff] }
  0xee   :  { %766 = vmatpush.msra.mxu0 %v2169_v24  ;;  %786 = vmatpush.msra.mxu1 %v2164_v23  ;;  %v3508_v23 = vld [vmem:[#allocation33_spill] sm:$0xff]  ;;  %v3509_v24 = vld [vmem:[#allocation32_spill] sm:$0xff] }
  0xef   :  { %806 = vmatpush.msra.mxu2 %v2103_v12  ;;  %826 = vmatpush.msra.mxu3 %v2108_v13  ;;  %v3498_v12 = vld [vmem:[#allocation14_spill] sm:$0xff]  ;;  %v3499_v13 = vld [vmem:[#allocation15_spill] sm:$0xff] }
  0xf0   :  { %767 = vmatpush.msra.mxu0 %v2193_v28  ;;  %787 = vmatpush.msra.mxu1 %v2188_v27  ;;  %v3512_v27 = vld [vmem:[#allocation35_spill] sm:$0xff]  ;;  %v3513_v28 = vld [vmem:[#allocation34_spill] sm:$0xff] }
  0xf1   :  { %807 = vmatpush.msra.mxu2 %v2128_v17  ;;  %827 = vmatpush.msra.mxu3 %v2133_v18  ;;  %v3502_v17 = vld [vmem:[#allocation16_spill] sm:$0xff]  ;;  %v3503_v18 = vld [vmem:[#allocation17_spill] sm:$0xff] }
  0xf2   :  { %768 = vmatpush.msra.mxu0 %v2234_v35  ;;  %788 = vmatpush.msra.mxu1 %v2212_v31  ;;  %v3516_v31 = vld [vmem:[#allocation37_spill] sm:$0xff]  ;;  %v3519_v35 = vld [vmem:[#allocation30_spill] sm:$0xff] }
  0xf3   :  { %808 = vmatpush.msra.mxu2 %v2152_v21  ;;  %828 = vmatpush.msra.mxu3 %v2157_v22  ;;  %v3506_v21 = vld [vmem:[#allocation18_spill] sm:$0xff]  ;;  %v3507_v22 = vld [vmem:[#allocation19_spill] sm:$0xff] }
  0xf4   :  { %769 = vmatpush.msra.mxu0 %v2258_v39  ;;  %789 = vmatpush.msra.mxu1 %v2241_v36 }
  0xf5   :  { %809 = vmatpush.msra.mxu2 %v2176_v25  ;;  %829 = vmatpush.msra.mxu3 %v2181_v26  ;;  %v3510_v25 = vld [vmem:[#allocation21_spill] sm:$0xff]  ;;  %v3511_v26 = vld [vmem:[#allocation22_spill] sm:$0xff] }
  0xf6   :  { %770 = vmatpush.msra.mxu0 %v2282_v43  ;;  %790 = vmatpush.msra.mxu1 %v2265_v40 }
  0xf7   :  { %810 = vmatpush.msra.mxu2 %v2200_v29  ;;  %830 = vmatpush.msra.mxu3 %v2205_v30  ;;  %v3514_v29 = vld [vmem:[#allocation25_spill] sm:$0xff]  ;;  %v3515_v30 = vld [vmem:[#allocation26_spill] sm:$0xff] }
  0xf8   :  { %771 = vmatpush.msra.mxu0 %v2308_v47  ;;  %791 = vmatpush.msra.mxu1 %v2289_v44 }
  0xf9   :  { %811 = vmatpush.msra.mxu2 %v2222_v33  ;;  %831 = vmatpush.msra.mxu3 %v2227_v34  ;;  %v3517_v33 = vld [vmem:[#allocation36_spill] sm:$0xff]  ;;  %v3518_v34 = vld [vmem:[#allocation29_spill] sm:$0xff] }
  0xfa   :  { %772 = vmatpush.msra.mxu0 %v2337_v52  ;;  %792 = vmatpush.msra.mxu1 %v2315_v48 }
  0xfb   :  { %812 = vmatpush.msra.mxu2 %v2246_v37  ;;  %832 = vmatpush.msra.mxu3 %v2253_v38 }
  0xfc   :  { %773 = vmatpush.msra.mxu0 %v2361_v56  ;;  %793 = vmatpush.msra.mxu1 %v2344_v53 }
  0xfd   :  { %813 = vmatpush.msra.mxu2 %v3494_v4  ;;  %833 = vmatpush.msra.mxu3 %v3495_v5 }
  0xfe   :  { %774 = vmatpush.msra.mxu0 %v3496_v8  ;;  %794 = vmatpush.msra.mxu1 %v3497_v9 }
  0xff   :  { %814 = vmatpush.msra.mxu2 %v3498_v12  ;;  %834 = vmatpush.msra.mxu3 %v3499_v13 }
 0x100   :  { %775 = vmatpush.msra.mxu0 %v3500_v15  ;;  %795 = vmatpush.msra.mxu1 %v3501_v16 }
 0x101   :  { %815 = vmatpush.msra.mxu2 %v3502_v17  ;;  %835 = vmatpush.msra.mxu3 %v3503_v18 }
 0x102   :  { %776 = vmatpush.msra.mxu0 %v3504_v19  ;;  %796 = vmatpush.msra.mxu1 %v3505_v20 }
 0x103   :  { %816 = vmatpush.msra.mxu2 %v3506_v21  ;;  %836 = vmatpush.msra.mxu3 %v3507_v22 }
 0x104   :  { %777 = vmatpush.msra.mxu0 %v3508_v23  ;;  %797 = vmatpush.msra.mxu1 %v3509_v24 }
 0x105   :  { %817 = vmatpush.msra.mxu2 %v3510_v25  ;;  %837 = vmatpush.msra.mxu3 %v3511_v26 }
 0x106   :  { %778 = vmatpush.msra.mxu0 %v3512_v27  ;;  %798 = vmatpush.msra.mxu1 %v3513_v28 }
 0x107   :  { %818 = vmatpush.msra.mxu2 %v3514_v29  ;;  %838 = vmatpush.msra.mxu3 %v3515_v30 }
 0x108   :  { %779 = vmatpush.msra.mxu0 %v3516_v31  ;;  %799 = vmatpush.msra.mxu1 %v3517_v33 }
 0x109   :  { %819 = vmatpush.msra.mxu2 %v3518_v34  ;;  %839 = vmatpush.msra.mxu3 %v3519_v35 }
 0x165   :  { %v447_v36 = vpop.f32.mrf.mxu1  ;;  %v427_v57 = vpop.f32.mrf.mxu0 }
 0x166   :  { %v494_v37 = vrot.slane %v447_v36, 7 }
 0x168   :  { %v497_v60 = vsel %vm311_vm3, %v427_v57, %v494_v37  ;;  %v500_v62 = vsel %vm317_vm4, %v427_v57, %v494_v37 }
 0x16c   :  { %v467_v38 = vpop.f32.mrf.mxu2  ;;  %v487_v40 = vpop.f32.mrf.mxu3 }
 0x16d   :  { %v495_v41 = vrot.slane %v467_v38, 6  ;;  %v496_v42 = vrot.slane %v487_v40, 5 }
 0x16f   :  { %v498_v55 = vsel %vm313_vm1, %v495_v41, %v496_v42  ;;  %v501_v2 = vsel %vm319_vm2, %v495_v41, %v496_v42 }
 0x170   :  { %v499_v1 = vsel %vm315_vm5, %v497_v60, %v498_v55  ;;  %v502_v51 = vsel %vm321_vm6, %v500_v62, %v501_v2 }
 0x171   :  { %v503_v49 = vrot.slane %v502_v51, 1  ;;  %v506_v11 = vadd.f32 %v499_v1, %v400_v10 }
 0x173   :  { %v507_v50 = vadd.f32 %v503_v49, %v402_v58  ;;  %v1728_v0 = vmul.f32 -1.442695, %v506_v11  ;;  %v548_v6 = vrot.slane %v506_v11, 3 }
 0x175   :  { %1764 = vpow2.f32 %v1728_v0  ;;  %v1729_v7 = vmul.f32 -1.442695, %v507_v50  ;;  %v549_v13 = vrot.slane %v507_v50, 3 }
 0x177   :  { %1766 = vpow2.f32 %v1729_v7 }
 0x17b   :  { %v1765_v61 = vpop.eup %1764 }
 0x17c   :  { %v514_v46 = vadd.f32 1.0, %v1765_v61 }
 0x17d   :  { %v1767_v14 = vpop.eup %1766 }
 0x17e   :  { %v515_v59 = vadd.f32 1.0, %v1767_v14  ;;  %1768 = vrcp.f32 %v514_v46  ;;  %v527_v12 = vand.u32 2147483648, %v514_v46  ;;  %v525_v18 = vand.u32 2147483647, %v514_v46 }
 0x17f   :  { %vm521_vm0 = vweird.f32 %v514_v46 }
 0x180   :  { %1770 = vrcp.f32 %v515_v59  ;;  %v542_v37 = vand.u32 2147483648, %v515_v59  ;;  %v540_v41 = vand.u32 2147483647, %v515_v59  ;;  %v528_v42 = vor.u32 1.1754944e-38, %v527_v12  ;;  %v2721_v12 = vld [vmem:[%s3365_s2 + $0x1f8] sm:$0xff] }
 0x181   :  { %1772 = vtanh.f32 %v548_v6  ;;  %vm526_vm9 = vcmp.eq.f32.partialorder %v525_v18, 8.507059e+37  ;;  %vm536_vm10 = vweird.f32 %v515_v59  ;;  %v2739_v18 = vld [vmem:[%s3365_s2 + $0x1d0] sm:$0xff] }
 0x182   :  { %1774 = vtanh.f32 %v549_v13  ;;  %v543_v55 = vor.u32 1.1754944e-38, %v542_v37  ;;  %vm541_vm12 = vcmp.eq.f32.partialorder %v540_v41, 8.507059e+37  ;;  %v2727_v13 = vld [vmem:[%s3365_s2 + $0x1c0] sm:$0xff]  ;;  %v2769_v41 = vld [vmem:[%s3365_s2 + $0x1b8] sm:$0xff] }
 0x183   :  { %v2751_v37 = vld [vmem:[%s3365_s2 + $0x1a0] sm:$0xff] }
 0x184   :  { %v1769_v3 = vpop.eup %1768 }
 0x185   :  { %v517_v32 = vmul.f32 %v1769_v3, %v514_v46  ;;  %vm522_vm15 = vweird.f32 %v1769_v3 }
 0x186   :  { %v1771_v45 = vpop.eup %1770  ;;  %vm523_vm8 = vmor %vm521_vm0, %vm522_vm15 }
 0x187   :  { %v518_v4 = vsub.f32 1.0, %v517_v32  ;;  %v532_v5 = vmul.f32 %v1771_v45, %v515_v59  ;;  %vm537_vm7 = vweird.f32 %v1771_v45  ;;  %v1773_v1 = vpop.eup %1772 }
 0x188   :  { %vm538_vm11 = vmor %vm536_vm10, %vm537_vm7  ;;  %v1775_v50 = vpop.eup %1774 }
 0x189   :  { %v519_v17 = vmul.f32 %v1769_v3, %v518_v4  ;;  %v533_v36 = vsub.f32 1.0, %v532_v5  ;;  %v2709_v4 = vld [vmem:[%s3365_s2 + $0x1e8] sm:$0xff]  ;;  %v2715_v5 = vld [vmem:[%s3365_s2 + $0x1f0] sm:$0xff] }
 0x18b   :  { %v520_v38 = vadd.f32 %v1769_v3, %v519_v17  ;;  %v534_v40 = vmul.f32 %v1771_v45, %v533_v36  ;;  %v2733_v17 = vld [vmem:[%s3365_s2 + $0x1c8] sm:$0xff]  ;;  %v2745_v36 = vld [vmem:[%s3365_s2 + $0x1d8] sm:$0xff] }
 0x18d   :  { %v524_v57 = vsel %vm523_vm8, %v1769_v3, %v520_v38  ;;  %v535_v60 = vadd.f32 %v1771_v45, %v534_v40  ;;  %v2757_v38 = vld [vmem:[%s3365_s2 + $0x1a8] sm:$0xff]  ;;  %v2763_v40 = vld [vmem:[%s3365_s2 + $0x1b0] sm:$0xff] }
 0x18e   :  { %v529_v62 = vsel %vm526_vm9, %v528_v42, %v524_v57  ;;  %v2775_v42 = vld [vmem:[%s3365_s2 + $0x180] sm:$0xff]  ;;  %v2781_v57 = vld [vmem:[%s3365_s2 + $0x188] sm:$0xff] }
 0x18f   :  { %v539_v2 = vsel %vm538_vm11, %v1771_v45, %v535_v60  ;;  %v556_v10 = vrot.slane %v529_v62, 1  ;;  %v562_v58 = vmul.f32 %v1773_v1, %v529_v62  ;;  %v568_v14 = vrot.slane %v529_v62, 2  ;;  %v2787_v60 = vld [vmem:[%s3365_s2 + $0x190] sm:$0xff]  ;;  %v2793_v62 = vld [vmem:[%s3365_s2 + $0x198] sm:$0xff] }
 0x190   :  { %v544_v51 = vsel %vm541_vm12, %v543_v55, %v539_v2  ;;  %v2799_v55 = vld [vmem:[%s3365_s2 + $0x160] sm:$0xff]  ;;  %v2805_v2 = vld [vmem:[%s3365_s2 + $0x168] sm:$0xff]  ;;  %v2817_v1 = vld [vmem:[%s3365_s2 + $0x178] sm:$0xff] }
 0x191   :  { %v557_v49 = vrot.slane %v544_v51, 1  ;;  %v560_v11 = vmul.f32 %v556_v10, %v2616_v63  ;;  %v563_v7 = vmul.f32 %v1775_v50, %v544_v51  ;;  %v569_v3 = vrot.slane %v544_v51, 2  ;;  %v2811_v10 = vld [vmem:[%s3365_s2 + $0x170] sm:$0xff]  ;;  %v2824_v51 = vld [vmem:[%s3365_s2 + $0x148] sm:$0xff]  ;;  %v2855_v50 = vld [vmem:[%s3365_s2 + $0x138] sm:$0xff] }
 0x193   :  { %v561_v0 = vmul.f32 %v557_v49, %v2618_v54  ;;  %v2694_v61 = vadd.f32 %v562_v58, %v560_v11  ;;  %v2703_v54 = vld [vmem:[%s3365_s2 + $0x1e0] sm:$0xff]  ;;  %v2830_v49 = vld [vmem:[%s3365_s2 + $0x150] sm:$0xff]  ;;  %v2836_v11 = vld [vmem:[%s3365_s2 + $0x158] sm:$0xff] }
 0x194   :  { %v2849_v58 = vld [vmem:[%s3365_s2 + $0x130] sm:$0xff] }
 0x195   :  { %v2696_v46 = vadd.f32 %v563_v7, %v561_v0  ;;  %1776 = vtanh.f32 %v2694_v61  ;;  %v2869_v0 = vld [vmem:[%s3365_s2 + $0x118] sm:$0xff] }
 0x197   :  { %1778 = vtanh.f32 %v2696_v46 }
 0x19b   :  { %v1777_v59 = vpop.eup %1776 }
 0x19c   :  { %v572_v32 = vmul.f32 %v1777_v59, %v568_v14 }
 0x19d   :  { %v1779_v45 = vpop.eup %1778 }
 0x19e   :  { %v573_v6 = vmul.f32 %v1779_v45, %v569_v3  ;;  %574 = vst [vmem:[#allocation5 + $0x1] sm:$0x1] %v572_v32 }
 0x19f   :  { %582 = vst [vmem:[#allocation1] ss:$9 sm:$0xff] %v572_v32 }
 0x1a0   :  { %575 = vst [vmem:[#allocation5 + $0x9] sm:$0x1] %v573_v6 }
 0x1a1   :  { %584 = vst [vmem:[#allocation1 + $0x1] ss:$9 sm:$0xff] %v573_v6 }
 0x1a8   :  { %v585_v63 = vld [vmem:[#allocation1] sm:$0xff] }
 0x1a9   :  { %603 = vmatmul.f32.vlgmr.msrb.gmra.mxu0 %v585_v63  ;;  %623 = vmatmul.f32.vlgmr.msrb.gmra.mxu1 %v585_v63 }
 0x1aa   :  { %643 = vmatmul.f32.vlgmr.msrb.gmra.mxu2 %v585_v63  ;;  %663 = vmatmul.f32.vlgmr.msrb.gmra.mxu3 %v585_v63 }
 0x1ab   :  { %941 = vmatpush.msrb.mxu0 %v2703_v54  ;;  %961 = vmatpush.msrb.mxu1 %v2709_v4 }
 0x1ac   :  { %981 = vmatpush.msrb.mxu2 %v2715_v5  ;;  %1001 = vmatpush.msrb.mxu3 %v2721_v12 }
 0x1ad   :  { %942 = vmatpush.msrb.mxu0 %v2727_v13  ;;  %962 = vmatpush.msrb.mxu1 %v2733_v17 }
 0x1ae   :  { %982 = vmatpush.msrb.mxu2 %v2739_v18  ;;  %1002 = vmatpush.msrb.mxu3 %v2745_v36 }
 0x1af   :  { %943 = vmatpush.msrb.mxu0 %v2751_v37  ;;  %963 = vmatpush.msrb.mxu1 %v2757_v38 }
 0x1b0   :  { %983 = vmatpush.msrb.mxu2 %v2763_v40  ;;  %1003 = vmatpush.msrb.mxu3 %v2769_v41 }
 0x1b1   :  { %944 = vmatpush.msrb.mxu0 %v2775_v42  ;;  %964 = vmatpush.msrb.mxu1 %v2781_v57 }
 0x1b2   :  { %984 = vmatpush.msrb.mxu2 %v2787_v60  ;;  %1004 = vmatpush.msrb.mxu3 %v2793_v62 }
 0x1b3   :  { %945 = vmatpush.msrb.mxu0 %v2799_v55  ;;  %965 = vmatpush.msrb.mxu1 %v2805_v2 }
 0x1b4   :  { %985 = vmatpush.msrb.mxu2 %v2811_v10  ;;  %1005 = vmatpush.msrb.mxu3 %v2817_v1 }
 0x1b5   :  { %946 = vmatpush.msrb.mxu0 %v2258_v39  ;;  %966 = vmatpush.msrb.mxu1 %v2824_v51  ;;  %v2843_v39 = vld [vmem:[%s3365_s2 + $0x128] sm:$0xff] }
 0x1b6   :  { %986 = vmatpush.msrb.mxu2 %v2830_v49  ;;  %1006 = vmatpush.msrb.mxu3 %v2836_v11 }
 0x1b7   :  { %947 = vmatpush.msrb.mxu0 %v2282_v43  ;;  %967 = vmatpush.msrb.mxu1 %v2843_v39  ;;  %v2863_v43 = vld [vmem:[%s3365_s2 + $0x110] sm:$0xff] }
 0x1b8   :  { %987 = vmatpush.msrb.mxu2 %v2849_v58  ;;  %1007 = vmatpush.msrb.mxu3 %v2855_v50 }
 0x1b9   :  { %948 = vmatpush.msrb.mxu0 %v2308_v47  ;;  %968 = vmatpush.msrb.mxu1 %v2289_v44  ;;  %v2877_v44 = vld [vmem:[%s3365_s2 + $0xf0] sm:$0xff]  ;;  %v2883_v47 = vld [vmem:[%s3365_s2 + $0xf8] sm:$0xff] }
 0x1ba   :  { %988 = vmatpush.msrb.mxu2 %v2863_v43  ;;  %1008 = vmatpush.msrb.mxu3 %v2869_v0 }
 0x1bb   :  { %949 = vmatpush.msrb.mxu0 %v2337_v52  ;;  %969 = vmatpush.msrb.mxu1 %v2315_v48  ;;  %v2891_v48 = vld [vmem:[%s3365_s2 + $0xd0] sm:$0xff]  ;;  %v2897_v52 = vld [vmem:[%s3365_s2 + $0xd8] sm:$0xff] }
 0x1bc   :  { %989 = vmatpush.msrb.mxu2 %v2877_v44  ;;  %1009 = vmatpush.msrb.mxu3 %v2883_v47  ;;  %3520 = vst [vmem:[#allocation12_spill] sm:$0xff] %v2897_v52 }
 0x1bd   :  { %950 = vmatpush.msrb.mxu0 %v2361_v56  ;;  %970 = vmatpush.msrb.mxu1 %v2344_v53  ;;  %v2905_v53 = vld [vmem:[%s3365_s2 + $0xb0] sm:$0xff]  ;;  %v2911_v56 = vld [vmem:[%s3365_s2 + $0xb8] sm:$0xff] }
 0x1be   :  { %990 = vmatpush.msrb.mxu2 %v2891_v48  ;;  %1010 = vmatpush.msrb.mxu3 %v2897_v52  ;;  %3521 = vst [vmem:[#allocation13_spill] sm:$0xff] %v2905_v53 }
 0x1bf   :  { %951 = vmatpush.msrb.mxu0 %v3496_v8  ;;  %971 = vmatpush.msrb.mxu1 %v3497_v9  ;;  %3522 = vst [vmem:[#allocation23_spill] sm:$0xff] %v2911_v56  ;;  %v2919_v8 = vld [vmem:[%s3365_s2 + $0x90] sm:$0xff]  ;;  %v2925_v9 = vld [vmem:[%s3365_s2 + $0x98] sm:$0xff] }
 0x1c0   :  { %991 = vmatpush.msrb.mxu2 %v2905_v53  ;;  %1011 = vmatpush.msrb.mxu3 %v2911_v56  ;;  %3523 = vst [vmem:[#allocation20_spill] sm:$0xff] %v2919_v8 }
 0x1c1   :  { %952 = vmatpush.msrb.mxu0 %v3500_v15  ;;  %972 = vmatpush.msrb.mxu1 %v3501_v16  ;;  %3524 = vst [vmem:[#allocation14_spill] sm:$0xff] %v2925_v9 }
 0x1c2   :  { %992 = vmatpush.msrb.mxu2 %v2919_v8  ;;  %1012 = vmatpush.msrb.mxu3 %v2925_v9 }
 0x1c3   :  { %953 = vmatpush.msrb.mxu0 %v3504_v19  ;;  %973 = vmatpush.msrb.mxu1 %v3505_v20 }
 0x1c4   :  { %993 = vmatpush.msrb.mxu2 %v3506_v21  ;;  %1013 = vmatpush.msrb.mxu3 %v3507_v22 }
 0x1c5   :  { %954 = vmatpush.msrb.mxu0 %v3508_v23  ;;  %974 = vmatpush.msrb.mxu1 %v3509_v24 }
 0x1c6   :  { %994 = vmatpush.msrb.mxu2 %v3510_v25  ;;  %1014 = vmatpush.msrb.mxu3 %v3511_v26 }
 0x1c7   :  { %955 = vmatpush.msrb.mxu0 %v3512_v27  ;;  %975 = vmatpush.msrb.mxu1 %v3513_v28  ;;  %v577_v28 = vld [vmem:[#allocation4 + $0x2] ss:$8 sm:$0xf] }
 0x1c8   :  { %995 = vmatpush.msrb.mxu2 %v3514_v29  ;;  %1015 = vmatpush.msrb.mxu3 %v3515_v30 }
 0x1c9   :  { %956 = vmatpush.msrb.mxu0 %v3516_v31  ;;  %976 = vmatpush.msrb.mxu1 %v3517_v33 }
 0x1ca   :  { %996 = vmatpush.msrb.mxu2 %v3518_v34  ;;  %1016 = vmatpush.msrb.mxu3 %v3519_v35  ;;  %v579_v34 = vld [vmem:[#allocation4 + $0x22] ss:$8 sm:$0xf] }
 0x226   :  { %v624_v15 = vpop.f32.mrf.mxu1  ;;  %v604_v23 = vpop.f32.mrf.mxu0 }
 0x227   :  { %v671_v16 = vrot.slane %v624_v15, 7 }
 0x229   :  { %v674_v24 = vsel %vm311_vm3, %v604_v23, %v671_v16  ;;  %v677_v25 = vsel %vm317_vm4, %v604_v23, %v671_v16 }
 0x22d   :  { %v644_v19 = vpop.f32.mrf.mxu2  ;;  %v664_v20 = vpop.f32.mrf.mxu3 }
 0x22e   :  { %v672_v21 = vrot.slane %v644_v19, 6  ;;  %v673_v22 = vrot.slane %v664_v20, 5 }
 0x230   :  { %v675_v26 = vsel %vm313_vm1, %v672_v21, %v673_v22  ;;  %v678_v27 = vsel %vm319_vm2, %v672_v21, %v673_v22 }
 0x231   :  { %v676_v29 = vsel %vm315_vm5, %v674_v24, %v675_v26  ;;  %v679_v30 = vsel %vm321_vm6, %v677_v25, %v678_v27 }
 0x232   :  { %v680_v31 = vrot.slane %v679_v30, 1  ;;  %v683_v33 = vadd.f32 %v676_v29, %v577_v28 }
 0x234   :  { %v684_v35 = vadd.f32 %v680_v31, %v579_v34  ;;  %v1730_v7 = vmul.f32 -1.442695, %v683_v33  ;;  %v725_v16 = vrot.slane %v683_v33, 3 }
 0x236   :  { %1780 = vpow2.f32 %v1730_v7  ;;  %v1731_v14 = vmul.f32 -1.442695, %v684_v35  ;;  %v726_v22 = vrot.slane %v684_v35, 3 }
 0x238   :  { %1782 = vpow2.f32 %v1731_v14 }
 0x23c   :  { %v1781_v59 = vpop.eup %1780 }
 0x23d   :  { %v691_v3 = vadd.f32 1.0, %v1781_v59 }
 0x23e   :  { %v1783_v32 = vpop.eup %1782 }
 0x23f   :  { %v692_v45 = vadd.f32 1.0, %v1783_v32  ;;  %1784 = vrcp.f32 %v691_v3  ;;  %v704_v21 = vand.u32 2147483648, %v691_v3  ;;  %v702_v24 = vand.u32 2147483647, %v691_v3 }
 0x240   :  { %vm698_vm14 = vweird.f32 %v691_v3 }
 0x241   :  { %1786 = vrcp.f32 %v692_v45  ;;  %v719_v26 = vand.u32 2147483648, %v692_v45  ;;  %v717_v29 = vand.u32 2147483647, %v692_v45  ;;  %v705_v30 = vor.u32 1.1754944e-38, %v704_v21 }
 0x242   :  { %1788 = vtanh.f32 %v725_v16  ;;  %vm703_vm7 = vcmp.eq.f32.partialorder %v702_v24, 8.507059e+37  ;;  %vm713_vm8 = vweird.f32 %v692_v45 }
 0x243   :  { %1790 = vtanh.f32 %v726_v22  ;;  %v720_v35 = vor.u32 1.1754944e-38, %v719_v26  ;;  %vm718_vm10 = vcmp.eq.f32.partialorder %v717_v29, 8.507059e+37  ;;  %v3005_v29 = vld [vmem:[%s3365_s2 + $0x108] sm:$0xff] }
 0x245   :  { %v1785_v6 = vpop.eup %1784 }
 0x246   :  { %v694_v63 = vmul.f32 %v1785_v6, %v691_v3  ;;  %vm699_vm13 = vweird.f32 %v1785_v6 }
 0x247   :  { %v1787_v15 = vpop.eup %1786  ;;  %vm700_vm0 = vmor %vm698_vm14, %vm699_vm13 }
 0x248   :  { %v695_v19 = vsub.f32 1.0, %v694_v63  ;;  %v709_v20 = vmul.f32 %v1787_v15, %v692_v45  ;;  %vm714_vm15 = vweird.f32 %v1787_v15  ;;  %v1789_v59 = vpop.eup %1788 }
 0x249   :  { %vm715_vm9 = vmor %vm713_vm8, %vm714_vm15 }
 0x24a   :  { %v696_v23 = vmul.f32 %v1785_v6, %v695_v19  ;;  %v710_v25 = vsub.f32 1.0, %v709_v20  ;;  %v1791_v19 = vpop.eup %1790 }
 0x24c   :  { %v697_v27 = vadd.f32 %v1785_v6, %v696_v23  ;;  %v711_v28 = vmul.f32 %v1787_v15, %v710_v25 }
 0x24e   :  { %v701_v31 = vsel %vm700_vm0, %v1785_v6, %v697_v27  ;;  %v712_v33 = vadd.f32 %v1787_v15, %v711_v28  ;;  %v2990_v27 = vld [vmem:[%s3365_s2 + $0x120] sm:$0xff] }
 0x24f   :  { %v706_v34 = vsel %vm703_vm7, %v705_v30, %v701_v31  ;;  %v2999_v28 = vld [vmem:[%s3365_s2 + $0x100] sm:$0xff]  ;;  %v3019_v31 = vld [vmem:[%s3365_s2 + $0xe8] sm:$0xff] }
 0x250   :  { %v716_v7 = vsel %vm715_vm9, %v1787_v15, %v712_v33  ;;  %v733_v14 = vrot.slane %v706_v34, 1  ;;  %v739_v16 = vmul.f32 %v1789_v59, %v706_v34  ;;  %v745_v45 = vrot.slane %v706_v34, 2  ;;  %v3013_v30 = vld [vmem:[%s3365_s2 + $0xe0] sm:$0xff]  ;;  %v3033_v34 = vld [vmem:[%s3365_s2 + $0xc8] sm:$0xff] }
 0x251   :  { %v721_v3 = vsel %vm718_vm10, %v720_v35, %v716_v7  ;;  %v3027_v33 = vld [vmem:[%s3365_s2 + $0xc0] sm:$0xff]  ;;  %v3047_v7 = vld [vmem:[%s3365_s2 + $0xa8] sm:$0xff] }
 0x252   :  { %v734_v32 = vrot.slane %v721_v3, 1  ;;  %v737_v63 = vmul.f32 %v733_v14, %v2694_v61  ;;  %v740_v21 = vmul.f32 %v1791_v19, %v721_v3  ;;  %v746_v23 = vrot.slane %v721_v3, 2  ;;  %v3041_v35 = vld [vmem:[%s3365_s2 + $0xa0] sm:$0xff]  ;;  %3526 = vst [vmem:[#allocation27_spill] sm:$0xff] %v3047_v7  ;;  %v3061_v59 = vld [vmem:[%s3365_s2 + $0x88] sm:$0xff] }
 0x253   :  { %3525 = vst [vmem:[#allocation15_spill] sm:$0xff] %v3041_v35  ;;  %v3055_v14 = vld [vmem:[%s3365_s2 + $0x80] sm:$0xff] }
 0x254   :  { %v738_v20 = vmul.f32 %v734_v32, %v2696_v46  ;;  %v2952_v6 = vadd.f32 %v739_v16, %v737_v63  ;;  %v2981_v46 = vld [vmem:[%s3365_s2 + $0x140] sm:$0xff]  ;;  %3527 = vst [vmem:[#allocation24_spill] sm:$0xff] %v3055_v14  ;;  %v3075_v32 = vld [vmem:[%s3365_s2 + $0x68] sm:$0xff]  ;;  %v3081_v63 = vld [vmem:[%s3365_s2 + $0x70] sm:$0xff] }
 0x255   :  { %3528 = vst [vmem:[#allocation16_spill] sm:$0xff] %v3061_v59  ;;  %v3069_v3 = vld [vmem:[%s3365_s2 + $0x60] sm:$0xff]  ;;  %v3087_v16 = vld [vmem:[%s3365_s2 + $0x78] sm:$0xff] }
 0x256   :  { %v2954_v22 = vadd.f32 %v740_v21, %v738_v20  ;;  %1792 = vtanh.f32 %v2952_v6  ;;  %3529 = vst [vmem:[#allocation17_spill] sm:$0xff] %v3069_v3  ;;  %v3093_v19 = vld [vmem:[%s3365_s2 + $0x40] sm:$0xff]  ;;  %v3099_v20 = vld [vmem:[%s3365_s2 + $0x48] sm:$0xff]  ;;  %v3105_v21 = vld [vmem:[%s3365_s2 + $0x50] sm:$0xff] }
 0x257   :  { %3530 = vst [vmem:[#allocation31_spill] sm:$0xff] %v3075_v32 }
 0x258   :  { %1794 = vtanh.f32 %v2954_v22  ;;  %3531 = vst [vmem:[#allocation28_spill] sm:$0xff] %v3081_v63 }
 0x259   :  { %3532 = vst [vmem:[#allocation18_spill] sm:$0xff] %v3087_v16 }
 0x25a   :  { %3533 = vst [vmem:[#allocation19_spill] sm:$0xff] %v3093_v19 }
 0x25b   :  { %3534 = vst [vmem:[#allocation33_spill] sm:$0xff] %v3099_v20 }
 0x25c   :  { %v1793_v15 = vpop.eup %1792  ;;  %3535 = vst [vmem:[#allocation32_spill] sm:$0xff] %v3105_v21 }
 0x25d   :  { %v749_v24 = vmul.f32 %v1793_v15, %v745_v45  ;;  %v3111_v45 = vld [vmem:[%s3365_s2 + $0x58] sm:$0xff]  ;;  %v3117_v15 = vld [vmem:[%s3365_s2 + $0x20] sm:$0xff] }
 0x25e   :  { %v1795_v25 = vpop.eup %1794  ;;  %3536 = vst [vmem:[#allocation21_spill] sm:$0xff] %v3111_v45 }
 0x25f   :  { %v750_v26 = vmul.f32 %v1795_v25, %v746_v23  ;;  %751 = vst [vmem:[#allocation5 + $0x2] sm:$0x1] %v749_v24  ;;  %v3123_v23 = vld [vmem:[%s3365_s2 + $0x28] sm:$0xff]  ;;  %v3135_v25 = vld [vmem:[%s3365_s2 + $0x38] sm:$0xff] }
 0x260   :  { %759 = vst [vmem:[#allocation1] ss:$9 sm:$0xff] %v749_v24  ;;  %v3129_v24 = vld [vmem:[%s3365_s2 + $0x30] sm:$0xff] }
 0x261   :  { %752 = vst [vmem:[#allocation5 + $0xa] sm:$0x1] %v750_v26 }
 0x262   :  { %761 = vst [vmem:[#allocation1 + $0x1] ss:$9 sm:$0xff] %v750_v26  ;;  %v3141_v26 = vld [vmem:[%s3365_s2] sm:$0xff] }
 0x263   :  { %3537 = vst [vmem:[#allocation22_spill] sm:$0xff] %v3117_v15 }
 0x264   :  { %3538 = vst [vmem:[#allocation35_spill] sm:$0xff] %v3123_v23 }
 0x265   :  { %3539 = vst [vmem:[#allocation34_spill] sm:$0xff] %v3129_v24 }
 0x266   :  { %3540 = vst [vmem:[#allocation25_spill] sm:$0xff] %v3135_v25 }
 0x267   :  { %3541 = vst [vmem:[#allocation26_spill] sm:$0xff] %v3141_v26 }
 0x269   :  { %v762_v61 = vld [vmem:[#allocation1] sm:$0xff] }
 0x26a   :  { %780 = vmatmul.f32.vlgmr.msra.gmra.mxu0 %v762_v61  ;;  %800 = vmatmul.f32.vlgmr.msra.gmra.mxu1 %v762_v61 }
 0x26b   :  { %820 = vmatmul.f32.vlgmr.msra.gmra.mxu2 %v762_v61  ;;  %840 = vmatmul.f32.vlgmr.msra.gmra.mxu3 %v762_v61  ;;  %v3147_v61 = vld [vmem:[%s3365_s2 + $0x8] sm:$0xff] }
 0x26c   :  { %1118 = vmatpush.msra.mxu0 %v2703_v54  ;;  %1138 = vmatpush.msra.mxu1 %v2709_v4  ;;  %3542 = vst [vmem:[#allocation37_spill] sm:$0xff] %v3147_v61 }
 0x26d   :  { %1158 = vmatpush.msra.mxu2 %v2715_v5  ;;  %1178 = vmatpush.msra.mxu3 %v2721_v12 }
 0x26e   :  { %1119 = vmatpush.msra.mxu0 %v2727_v13  ;;  %1139 = vmatpush.msra.mxu1 %v2733_v17 }
 0x26f   :  { %1159 = vmatpush.msra.mxu2 %v2739_v18  ;;  %1179 = vmatpush.msra.mxu3 %v2745_v36 }
 0x270   :  { %1120 = vmatpush.msra.mxu0 %v2751_v37  ;;  %1140 = vmatpush.msra.mxu1 %v2757_v38 }
 0x271   :  { %1160 = vmatpush.msra.mxu2 %v2763_v40  ;;  %1180 = vmatpush.msra.mxu3 %v2769_v41 }
 0x272   :  { %1121 = vmatpush.msra.mxu0 %v2775_v42  ;;  %1141 = vmatpush.msra.mxu1 %v2781_v57 }
 0x273   :  { %1161 = vmatpush.msra.mxu2 %v2787_v60  ;;  %1181 = vmatpush.msra.mxu3 %v2793_v62 }
 0x274   :  { %1122 = vmatpush.msra.mxu0 %v2799_v55  ;;  %1142 = vmatpush.msra.mxu1 %v2805_v2 }
 0x275   :  { %1162 = vmatpush.msra.mxu2 %v2811_v10  ;;  %1182 = vmatpush.msra.mxu3 %v2817_v1 }
 0x276   :  { %1123 = vmatpush.msra.mxu0 %v2981_v46  ;;  %1143 = vmatpush.msra.mxu1 %v2824_v51 }
 0x277   :  { %1163 = vmatpush.msra.mxu2 %v2830_v49  ;;  %1183 = vmatpush.msra.mxu3 %v2836_v11 }
 0x278   :  { %1124 = vmatpush.msra.mxu0 %v2990_v27  ;;  %1144 = vmatpush.msra.mxu1 %v2843_v39 }
 0x279   :  { %1164 = vmatpush.msra.mxu2 %v2849_v58  ;;  %1184 = vmatpush.msra.mxu3 %v2855_v50 }
 0x27a   :  { %1125 = vmatpush.msra.mxu0 %v2999_v28  ;;  %1145 = vmatpush.msra.mxu1 %v3005_v29 }
 0x27b   :  { %1165 = vmatpush.msra.mxu2 %v2863_v43  ;;  %1185 = vmatpush.msra.mxu3 %v2869_v0 }
 0x27c   :  { %1126 = vmatpush.msra.mxu0 %v3013_v30  ;;  %1146 = vmatpush.msra.mxu1 %v3019_v31 }
 0x27d   :  { %1166 = vmatpush.msra.mxu2 %v2877_v44  ;;  %1186 = vmatpush.msra.mxu3 %v2883_v47 }
 0x27e   :  { %1127 = vmatpush.msra.mxu0 %v3027_v33  ;;  %1147 = vmatpush.msra.mxu1 %v3033_v34 }
 0x27f   :  { %1167 = vmatpush.msra.mxu2 %v2891_v48  ;;  %1187 = vmatpush.msra.mxu3 %v2897_v52 }
 0x280   :  { %1128 = vmatpush.msra.mxu0 %v3041_v35  ;;  %1148 = vmatpush.msra.mxu1 %v3047_v7 }
 0x281   :  { %1168 = vmatpush.msra.mxu2 %v2905_v53  ;;  %1188 = vmatpush.msra.mxu3 %v2911_v56 }
 0x282   :  { %1129 = vmatpush.msra.mxu0 %v3055_v14  ;;  %1149 = vmatpush.msra.mxu1 %v3061_v59 }
 0x283   :  { %1169 = vmatpush.msra.mxu2 %v2919_v8  ;;  %1189 = vmatpush.msra.mxu3 %v2925_v9  ;;  %v756_v8 = vld [vmem:[#allocation4 + $0x23] ss:$8 sm:$0xf] }
 0x284   :  { %1130 = vmatpush.msra.mxu0 %v3069_v3  ;;  %1150 = vmatpush.msra.mxu1 %v3075_v32  ;;  %v754_v32 = vld [vmem:[#allocation4 + $0x3] ss:$8 sm:$0xf] }
 0x285   :  { %1170 = vmatpush.msra.mxu2 %v3081_v63  ;;  %1190 = vmatpush.msra.mxu3 %v3087_v16 }
 0x286   :  { %1131 = vmatpush.msra.mxu0 %v3093_v19  ;;  %1151 = vmatpush.msra.mxu1 %v3099_v20 }
 0x287   :  { %1171 = vmatpush.msra.mxu2 %v3105_v21  ;;  %1191 = vmatpush.msra.mxu3 %v3111_v45 }
 0x288   :  { %1132 = vmatpush.msra.mxu0 %v3117_v15  ;;  %1152 = vmatpush.msra.mxu1 %v3123_v23 }
 0x289   :  { %1172 = vmatpush.msra.mxu2 %v3129_v24  ;;  %1192 = vmatpush.msra.mxu3 %v3135_v25  ;;  %v3153_v24 = vld [vmem:[%s3365_s2 + $0x10] sm:$0xff]  ;;  %v3159_v25 = vld [vmem:[%s3365_s2 + $0x18] sm:$0xff]  ;;  %s2017_s2 = smov [#allocation5]  }
 0x28a   :  { %1133 = vmatpush.msra.mxu0 %v3141_v26  ;;  %1153 = vmatpush.msra.mxu1 %v3147_v61  ;;  %3543 = vst [vmem:[#allocation36_spill] sm:$0xff] %v3153_v24  ;;  %s1673_s13 = sshll.u32 %s2017_s2, 4  ;;  %s1674_s13 = int_to_ptr.vmem [resolvable:$true] %s1673_s13 }
 0x28b   :  { %1173 = vmatpush.msra.mxu2 %v3153_v24  ;;  %3544 = vst [vmem:[#allocation29_spill] sm:$0xff] %v3159_v25  ;;  %1193 = vmatpush.msra.mxu3 %v3159_v25 }
 0x2e7   :  { %v801_v26 = vpop.f32.mrf.mxu1  ;;  %v781_v20 = vpop.f32.mrf.mxu0 }
 0x2e8   :  { %v848_v23 = vrot.slane %v801_v26, 7 }
 0x2ea   :  { %v851_v19 = vsel %vm311_vm3, %v781_v20, %v848_v23  ;;  %v854_v16 = vsel %vm317_vm4, %v781_v20, %v848_v23 }
 0x2ee   :  { %v821_v15 = vpop.f32.mrf.mxu2  ;;  %v841_v45 = vpop.f32.mrf.mxu3 }
 0x2ef   :  { %v849_v21 = vrot.slane %v821_v15, 6  ;;  %v850_v61 = vrot.slane %v841_v45, 5 }
 0x2f1   :  { %v852_v24 = vsel %vm313_vm1, %v849_v21, %v850_v61  ;;  %v855_v63 = vsel %vm319_vm2, %v849_v21, %v850_v61 }
 0x2f2   :  { %v853_v3 = vsel %vm315_vm5, %v851_v19, %v852_v24  ;;  %v856_v25 = vsel %vm321_vm6, %v854_v16, %v855_v63 }
 0x2f3   :  { %v857_v9 = vrot.slane %v856_v25, 1  ;;  %v860_v26 = vadd.f32 %v853_v3, %v754_v32 }
 0x2f5   :  { %v861_v59 = vadd.f32 %v857_v9, %v756_v8  ;;  %v1732_v15 = vmul.f32 -1.442695, %v860_v26  ;;  %v902_v19 = vrot.slane %v860_v26, 3 }
 0x2f7   :  { %1796 = vpow2.f32 %v1732_v15  ;;  %v1733_v45 = vmul.f32 -1.442695, %v861_v59  ;;  %v903_v3 = vrot.slane %v861_v59, 3 }
 0x2f9   :  { %1798 = vpow2.f32 %v1733_v45 }
 0x2fd   :  { %v1797_v14 = vpop.eup %1796 }
 0x2fe   :  { %v868_v56 = vadd.f32 1.0, %v1797_v14 }
 0x2ff   :  { %v1799_v20 = vpop.eup %1798 }
 0x300   :  { %v869_v23 = vadd.f32 1.0, %v1799_v20  ;;  %1800 = vrcp.f32 %v868_v56  ;;  %v881_v16 = vand.u32 2147483648, %v868_v56  ;;  %v879_v8 = vand.u32 2147483647, %v868_v56 }
 0x301   :  { %vm875_vm12 = vweird.f32 %v868_v56 }
 0x302   :  { %1802 = vrcp.f32 %v869_v23  ;;  %v896_v25 = vand.u32 2147483648, %v869_v23  ;;  %v894_v45 = vand.u32 2147483647, %v869_v23  ;;  %v882_v20 = vor.u32 1.1754944e-38, %v881_v16 }
 0x303   :  { %1804 = vtanh.f32 %v902_v19  ;;  %vm880_vm15 = vcmp.eq.f32.partialorder %v879_v8, 8.507059e+37  ;;  %vm890_vm0 = vweird.f32 %v869_v23 }
 0x304   :  { %1806 = vtanh.f32 %v903_v3  ;;  %v897_v59 = vor.u32 1.1754944e-38, %v896_v25  ;;  %vm895_vm8 = vcmp.eq.f32.partialorder %v894_v45, 8.507059e+37  ;;  %v3548_v45 = vld [vmem:[#allocation13_spill] sm:$0xff] }
 0x306   :  { %v1801_v21 = vpop.eup %1800 }
 0x307   :  { %v871_v61 = vmul.f32 %v1801_v21, %v868_v56  ;;  %vm876_vm11 = vweird.f32 %v1801_v21 }
 0x308   :  { %v1803_v53 = vpop.eup %1802  ;;  %vm877_vm14 = vmor %vm875_vm12, %vm876_vm11 }
 0x309   :  { %v872_v24 = vsub.f32 1.0, %v871_v61  ;;  %v886_v63 = vmul.f32 %v1803_v53, %v869_v23  ;;  %vm891_vm13 = vweird.f32 %v1803_v53  ;;  %v1805_v56 = vpop.eup %1804 }
 0x30a   :  { %vm892_vm7 = vmor %vm890_vm0, %vm891_vm13  ;;  %v1807_v52 = vpop.eup %1806 }
 0x30b   :  { %v873_v32 = vmul.f32 %v1801_v21, %v872_v24  ;;  %v887_v9 = vsub.f32 1.0, %v886_v63 }
 0x30d   :  { %v874_v14 = vadd.f32 %v1801_v21, %v873_v32  ;;  %v888_v15 = vmul.f32 %v1803_v53, %v887_v9 }
 0x30f   :  { %v878_v7 = vsel %vm877_vm14, %v1801_v21, %v874_v14  ;;  %v889_v26 = vadd.f32 %v1803_v53, %v888_v15 }
 0x310   :  { %v883_v61 = vsel %vm880_vm15, %v882_v20, %v878_v7  ;;  %v3549_v20 = vld [vmem:[#allocation23_spill] sm:$0xff] }
 0x311   :  { %v893_v24 = vsel %vm892_vm7, %v1803_v53, %v889_v26  ;;  %v910_v63 = vrot.slane %v883_v61, 1  ;;  %v916_v9 = vmul.f32 %v1805_v56, %v883_v61  ;;  %v922_v53 = vrot.slane %v883_v61, 2  ;;  %v3550_v26 = vld [vmem:[#allocation24_spill] sm:$0xff]  ;;  %v3555_v56 = vld [vmem:[#allocation31_spill] sm:$0xff] }
 0x312   :  { %v898_v35 = vsel %vm895_vm8, %v897_v59, %v893_v24  ;;  %v3551_v61 = vld [vmem:[#allocation16_spill] sm:$0xff]  ;;  %v3553_v24 = vld [vmem:[#allocation14_spill] sm:$0xff] }
 0x313   :  { %v911_v19 = vrot.slane %v898_v35, 1  ;;  %v914_v32 = vmul.f32 %v910_v63, %v2952_v6  ;;  %v917_v3 = vmul.f32 %v1807_v52, %v898_v35  ;;  %v923_v23 = vrot.slane %v898_v35, 2  ;;  %v3545_v52 = vld [vmem:[#allocation12_spill] sm:$0xff]  ;;  %v3547_v35 = vld [vmem:[#allocation27_spill] sm:$0xff]  ;;  %v3554_v63 = vld [vmem:[#allocation17_spill] sm:$0xff] }
 0x314   :  { %v3552_v59 = vld [vmem:[#allocation20_spill] sm:$0xff] }
 0x315   :  { %v915_v16 = vmul.f32 %v911_v19, %v2954_v22  ;;  %v3170_v21 = vadd.f32 %v916_v9, %v914_v32  ;;  %v3546_v22 = vld [vmem:[#allocation15_spill] sm:$0xff]  ;;  %v3556_v19 = vld [vmem:[#allocation28_spill] sm:$0xff]  ;;  %v3557_v32 = vld [vmem:[#allocation18_spill] sm:$0xff] }
 0x316   :  { %v3558_v9 = vld [vmem:[#allocation19_spill] sm:$0xff] }
 0x317   :  { %v3172_v8 = vadd.f32 %v917_v3, %v915_v16  ;;  %1808 = vtanh.f32 %v3170_v21  ;;  %v3559_v16 = vld [vmem:[#allocation33_spill] sm:$0xff]  ;;  %v3560_v3 = vld [vmem:[#allocation32_spill] sm:$0xff] }
 0x319   :  { %1810 = vtanh.f32 %v3172_v8 }
 0x31d   :  { %v1809_v7 = vpop.eup %1808 }
 0x31e   :  { %v926_v25 = vmul.f32 %v1809_v7, %v922_v53  ;;  %v3561_v53 = vld [vmem:[#allocation21_spill] sm:$0xff]  ;;  %v3562_v7 = vld [vmem:[#allocation22_spill] sm:$0xff] }
 0x31f   :  { %v1811_v14 = vpop.eup %1810 }
 0x320   :  { %v927_v15 = vmul.f32 %v1811_v14, %v923_v23  ;;  %928 = vst [vmem:[#allocation5 + $0x3] sm:$0x1] %v926_v25  ;;  %v3563_v23 = vld [vmem:[#allocation35_spill] sm:$0xff]  ;;  %v3565_v14 = vld [vmem:[#allocation25_spill] sm:$0xff] }
 0x321   :  { %936 = vst [vmem:[#allocation1] ss:$9 sm:$0xff] %v926_v25  ;;  %v3564_v25 = vld [vmem:[#allocation34_spill] sm:$0xff] }
 0x322   :  { %929 = vst [vmem:[#allocation5 + $0xb] sm:$0x1] %v927_v15 }
 0x323   :  { %938 = vst [vmem:[#allocation1 + $0x1] ss:$9 sm:$0xff] %v927_v15  ;;  %v3566_v15 = vld [vmem:[#allocation26_spill] sm:$0xff] }
 0x32a   :  { %v939_v6 = vld [vmem:[#allocation1] sm:$0xff] }
 0x32b   :  { %957 = vmatmul.f32.vlgmr.msrb.gmra.mxu0 %v939_v6  ;;  %977 = vmatmul.f32.vlgmr.msrb.gmra.mxu1 %v939_v6 }
 0x32c   :  { %997 = vmatmul.f32.vlgmr.msrb.gmra.mxu2 %v939_v6  ;;  %1017 = vmatmul.f32.vlgmr.msrb.gmra.mxu3 %v939_v6  ;;  %v3567_v6 = vld [vmem:[#allocation37_spill] sm:$0xff] }
 0x32d   :  { %1295 = vmatpush.msrb.mxu0 %v2703_v54  ;;  %1315 = vmatpush.msrb.mxu1 %v2709_v4 }
 0x32e   :  { %1335 = vmatpush.msrb.mxu2 %v2715_v5  ;;  %1355 = vmatpush.msrb.mxu3 %v2721_v12 }
 0x32f   :  { %1296 = vmatpush.msrb.mxu0 %v2727_v13  ;;  %1316 = vmatpush.msrb.mxu1 %v2733_v17 }
 0x330   :  { %1336 = vmatpush.msrb.mxu2 %v2739_v18  ;;  %1356 = vmatpush.msrb.mxu3 %v2745_v36 }
 0x331   :  { %1297 = vmatpush.msrb.mxu0 %v2751_v37  ;;  %1317 = vmatpush.msrb.mxu1 %v2757_v38 }
 0x332   :  { %1337 = vmatpush.msrb.mxu2 %v2763_v40  ;;  %1357 = vmatpush.msrb.mxu3 %v2769_v41 }
 0x333   :  { %1298 = vmatpush.msrb.mxu0 %v2775_v42  ;;  %1318 = vmatpush.msrb.mxu1 %v2781_v57 }
 0x334   :  { %1338 = vmatpush.msrb.mxu2 %v2787_v60  ;;  %1358 = vmatpush.msrb.mxu3 %v2793_v62 }
 0x335   :  { %1299 = vmatpush.msrb.mxu0 %v2799_v55  ;;  %1319 = vmatpush.msrb.mxu1 %v2805_v2 }
 0x336   :  { %1339 = vmatpush.msrb.mxu2 %v2811_v10  ;;  %1359 = vmatpush.msrb.mxu3 %v2817_v1 }
 0x337   :  { %1300 = vmatpush.msrb.mxu0 %v2981_v46  ;;  %1320 = vmatpush.msrb.mxu1 %v2824_v51 }
 0x338   :  { %1340 = vmatpush.msrb.mxu2 %v2830_v49  ;;  %1360 = vmatpush.msrb.mxu3 %v2836_v11 }
 0x339   :  { %1301 = vmatpush.msrb.mxu0 %v2990_v27  ;;  %1321 = vmatpush.msrb.mxu1 %v2843_v39 }
 0x33a   :  { %1341 = vmatpush.msrb.mxu2 %v2849_v58  ;;  %1361 = vmatpush.msrb.mxu3 %v2855_v50 }
 0x33b   :  { %1302 = vmatpush.msrb.mxu0 %v2999_v28  ;;  %1322 = vmatpush.msrb.mxu1 %v3005_v29 }
 0x33c   :  { %1342 = vmatpush.msrb.mxu2 %v2863_v43  ;;  %1362 = vmatpush.msrb.mxu3 %v2869_v0 }
 0x33d   :  { %1303 = vmatpush.msrb.mxu0 %v3013_v30  ;;  %1323 = vmatpush.msrb.mxu1 %v3019_v31 }
 0x33e   :  { %1343 = vmatpush.msrb.mxu2 %v2877_v44  ;;  %1363 = vmatpush.msrb.mxu3 %v2883_v47 }
 0x33f   :  { %1304 = vmatpush.msrb.mxu0 %v3027_v33  ;;  %1324 = vmatpush.msrb.mxu1 %v3033_v34 }
 0x340   :  { %1344 = vmatpush.msrb.mxu2 %v2891_v48  ;;  %1364 = vmatpush.msrb.mxu3 %v3545_v52 }
 0x341   :  { %1305 = vmatpush.msrb.mxu0 %v3546_v22  ;;  %1325 = vmatpush.msrb.mxu1 %v3547_v35 }
 0x342   :  { %1345 = vmatpush.msrb.mxu2 %v3548_v45  ;;  %1365 = vmatpush.msrb.mxu3 %v3549_v20 }
 0x343   :  { %1306 = vmatpush.msrb.mxu0 %v3550_v26  ;;  %1326 = vmatpush.msrb.mxu1 %v3551_v61 }
 0x344   :  { %1346 = vmatpush.msrb.mxu2 %v3552_v59  ;;  %1366 = vmatpush.msrb.mxu3 %v3553_v24  ;;  %v933_v59 = vld [vmem:[#allocation4 + $0x24] ss:$8 sm:$0xf] }
 0x345   :  { %1307 = vmatpush.msrb.mxu0 %v3554_v63  ;;  %1327 = vmatpush.msrb.mxu1 %v3555_v56 }
 0x346   :  { %1347 = vmatpush.msrb.mxu2 %v3556_v19  ;;  %1367 = vmatpush.msrb.mxu3 %v3557_v32  ;;  %v3568_v32 = vld [vmem:[#allocation36_spill] sm:$0xff] }
 0x347   :  { %1308 = vmatpush.msrb.mxu0 %v3558_v9  ;;  %1328 = vmatpush.msrb.mxu1 %v3559_v16  ;;  %v3569_v9 = vld [vmem:[#allocation29_spill] sm:$0xff] }
 0x348   :  { %1348 = vmatpush.msrb.mxu2 %v3560_v3  ;;  %1368 = vmatpush.msrb.mxu3 %v3561_v53 }
 0x349   :  { %1309 = vmatpush.msrb.mxu0 %v3562_v7  ;;  %1329 = vmatpush.msrb.mxu1 %v3563_v23 }
 0x34a   :  { %1349 = vmatpush.msrb.mxu2 %v3564_v25  ;;  %1369 = vmatpush.msrb.mxu3 %v3565_v14 }
 0x34b   :  { %1310 = vmatpush.msrb.mxu0 %v3566_v15  ;;  %1330 = vmatpush.msrb.mxu1 %v3567_v6  ;;  %v931_v6 = vld [vmem:[#allocation4 + $0x4] ss:$8 sm:$0xf] }
 0x34c   :  { %1350 = vmatpush.msrb.mxu2 %v3568_v32  ;;  %1370 = vmatpush.msrb.mxu3 %v3569_v9 }
 0x3a8   :  { %v978_v16 = vpop.f32.mrf.mxu1  ;;  %v958_v63 = vpop.f32.mrf.mxu0 }
 0x3a9   :  { %v1025_v3 = vrot.slane %v978_v16, 7 }
 0x3ab   :  { %v1028_v23 = vsel %vm311_vm3, %v958_v63, %v1025_v3  ;;  %v1031_v25 = vsel %vm317_vm4, %v958_v63, %v1025_v3 }
 0x3af   :  { %v998_v19 = vpop.f32.mrf.mxu2  ;;  %v1018_v53 = vpop.f32.mrf.mxu3 }
 0x3b0   :  { %v1026_v56 = vrot.slane %v998_v19, 6  ;;  %v1027_v7 = vrot.slane %v1018_v53, 5 }
 0x3b2   :  { %v1029_v14 = vsel %vm313_vm1, %v1026_v56, %v1027_v7  ;;  %v1032_v15 = vsel %vm319_vm2, %v1026_v56, %v1027_v7 }
 0x3b3   :  { %v1030_v32 = vsel %vm315_vm5, %v1028_v23, %v1029_v14  ;;  %v1033_v9 = vsel %vm321_vm6, %v1031_v25, %v1032_v15 }
 0x3b4   :  { %v1034_v24 = vrot.slane %v1033_v9, 1  ;;  %v1037_v16 = vadd.f32 %v1030_v32, %v931_v6 }
 0x3b6   :  { %v1038_v61 = vadd.f32 %v1034_v24, %v933_v59  ;;  %v1734_v19 = vmul.f32 -1.442695, %v1037_v16  ;;  %v1079_v23 = vrot.slane %v1037_v16, 3 }
 0x3b8   :  { %1812 = vpow2.f32 %v1734_v19  ;;  %v1735_v53 = vmul.f32 -1.442695, %v1038_v61  ;;  %v1080_v32 = vrot.slane %v1038_v61, 3 }
 0x3ba   :  { %1814 = vpow2.f32 %v1735_v53 }
 0x3be   :  { %v1813_v26 = vpop.eup %1812 }
 0x3bf   :  { %v1045_v20 = vadd.f32 1.0, %v1813_v26 }
 0x3c0   :  { %v1815_v63 = vpop.eup %1814 }
 0x3c1   :  { %v1046_v3 = vadd.f32 1.0, %v1815_v63  ;;  %1816 = vrcp.f32 %v1045_v20  ;;  %v1058_v9 = vand.u32 2147483648, %v1045_v20  ;;  %v1056_v59 = vand.u32 2147483647, %v1045_v20 }
 0x3c2   :  { %vm1052_vm10 = vweird.f32 %v1045_v20 }
 0x3c3   :  { %1818 = vrcp.f32 %v1046_v3  ;;  %v1073_v6 = vand.u32 2147483648, %v1046_v3  ;;  %v1071_v53 = vand.u32 2147483647, %v1046_v3  ;;  %v1059_v63 = vor.u32 1.1754944e-38, %v1058_v9 }
 0x3c4   :  { %1820 = vtanh.f32 %v1079_v23  ;;  %vm1057_vm13 = vcmp.eq.f32.partialorder %v1056_v59, 8.507059e+37  ;;  %vm1067_vm14 = vweird.f32 %v1046_v3 }
 0x3c5   :  { %1822 = vtanh.f32 %v1080_v32  ;;  %v1074_v61 = vor.u32 1.1754944e-38, %v1073_v6  ;;  %vm1072_vm0 = vcmp.eq.f32.partialorder %v1071_v53, 8.507059e+37 }
 0x3c7   :  { %v1817_v56 = vpop.eup %1816 }
 0x3c8   :  { %v1048_v7 = vmul.f32 %v1817_v56, %v1045_v20  ;;  %vm1053_vm9 = vweird.f32 %v1817_v56 }
 0x3c9   :  { %v1819_v45 = vpop.eup %1818  ;;  %vm1054_vm12 = vmor %vm1052_vm10, %vm1053_vm9 }
 0x3ca   :  { %v1049_v14 = vsub.f32 1.0, %v1048_v7  ;;  %v1063_v25 = vmul.f32 %v1819_v45, %v1046_v3  ;;  %vm1068_vm11 = vweird.f32 %v1819_v45  ;;  %v1821_v20 = vpop.eup %1820 }
 0x3cb   :  { %vm1069_vm15 = vmor %vm1067_vm14, %vm1068_vm11  ;;  %v1823_v52 = vpop.eup %1822 }
 0x3cc   :  { %v1050_v15 = vmul.f32 %v1817_v56, %v1049_v14  ;;  %v1064_v24 = vsub.f32 1.0, %v1063_v25 }
 0x3ce   :  { %v1051_v26 = vadd.f32 %v1817_v56, %v1050_v15  ;;  %v1065_v19 = vmul.f32 %v1819_v45, %v1064_v24 }
 0x3d0   :  { %v1055_v35 = vsel %vm1054_vm12, %v1817_v56, %v1051_v26  ;;  %v1066_v16 = vadd.f32 %v1819_v45, %v1065_v19 }
 0x3d1   :  { %v1060_v7 = vsel %vm1057_vm13, %v1059_v63, %v1055_v35 }
 0x3d2   :  { %v1070_v14 = vsel %vm1069_vm15, %v1819_v45, %v1066_v16  ;;  %v1087_v25 = vrot.slane %v1060_v7, 1  ;;  %v1093_v24 = vmul.f32 %v1821_v20, %v1060_v7  ;;  %v1099_v35 = vrot.slane %v1060_v7, 2 }
 0x3d3   :  { %v1075_v22 = vsel %vm1072_vm0, %v1074_v61, %v1070_v14 }
 0x3d4   :  { %v1088_v23 = vrot.slane %v1075_v22, 1  ;;  %v1091_v15 = vmul.f32 %v1087_v25, %v3170_v21  ;;  %v1094_v32 = vmul.f32 %v1823_v52, %v1075_v22  ;;  %v1100_v3 = vrot.slane %v1075_v22, 2  ;;  %v1110_v22 = vld [vmem:[#allocation4 + $0x25] ss:$8 sm:$0xf] }
 0x3d6   :  { %v1092_v9 = vmul.f32 %v1088_v23, %v3172_v8  ;;  %v3248_v56 = vadd.f32 %v1093_v24, %v1091_v15 }
 0x3d8   :  { %v3250_v59 = vadd.f32 %v1094_v32, %v1092_v9  ;;  %1824 = vtanh.f32 %v3248_v56 }
 0x3da   :  { %1826 = vtanh.f32 %v3250_v59 }
 0x3de   :  { %v1825_v45 = vpop.eup %1824 }
 0x3df   :  { %v1103_v6 = vmul.f32 %v1825_v45, %v1099_v35 }
 0x3e0   :  { %v1827_v26 = vpop.eup %1826 }
 0x3e1   :  { %v1104_v19 = vmul.f32 %v1827_v26, %v1100_v3  ;;  %1105 = vst [vmem:[#allocation5 + $0x4] sm:$0x1] %v1103_v6 }
 0x3e2   :  { %1113 = vst [vmem:[#allocation1] ss:$9 sm:$0xff] %v1103_v6 }
 0x3e3   :  { %1106 = vst [vmem:[#allocation5 + $0xc] sm:$0x1] %v1104_v19 }
 0x3e4   :  { %1115 = vst [vmem:[#allocation1 + $0x1] ss:$9 sm:$0xff] %v1104_v19 }
 0x3eb   :  { %v1116_v21 = vld [vmem:[#allocation1] sm:$0xff] }
 0x3ec   :  { %1134 = vmatmul.f32.vlgmr.msra.gmra.mxu0 %v1116_v21  ;;  %1154 = vmatmul.f32.vlgmr.msra.gmra.mxu1 %v1116_v21 }
 0x3ed   :  { %1174 = vmatmul.f32.vlgmr.msra.gmra.mxu2 %v1116_v21  ;;  %1194 = vmatmul.f32.vlgmr.msra.gmra.mxu3 %v1116_v21 }
 0x3ee   :  { %1472 = vmatpush.msra.mxu0 %v2703_v54  ;;  %1492 = vmatpush.msra.mxu1 %v2709_v4  ;;  %v3570_v54 = vld [vmem:[#allocation12_spill] sm:$0xff]  ;;  %v3571_v4 = vld [vmem:[#allocation15_spill] sm:$0xff] }
 0x3ef   :  { %1512 = vmatpush.msra.mxu2 %v2715_v5  ;;  %1532 = vmatpush.msra.mxu3 %v2721_v12  ;;  %v3572_v5 = vld [vmem:[#allocation27_spill] sm:$0xff]  ;;  %v3573_v12 = vld [vmem:[#allocation13_spill] sm:$0xff] }
 0x3f0   :  { %1473 = vmatpush.msra.mxu0 %v2727_v13  ;;  %1493 = vmatpush.msra.mxu1 %v2733_v17  ;;  %v3574_v13 = vld [vmem:[#allocation23_spill] sm:$0xff]  ;;  %v3575_v17 = vld [vmem:[#allocation24_spill] sm:$0xff] }
 0x3f1   :  { %1513 = vmatpush.msra.mxu2 %v2739_v18  ;;  %1533 = vmatpush.msra.mxu3 %v2745_v36  ;;  %v3576_v18 = vld [vmem:[#allocation16_spill] sm:$0xff] }
 0x3f2   :  { %1474 = vmatpush.msra.mxu0 %v2751_v37  ;;  %1494 = vmatpush.msra.mxu1 %v2757_v38  ;;  %v3577_v36 = vld [vmem:[#allocation20_spill] sm:$0xff]  ;;  %v3578_v37 = vld [vmem:[#allocation14_spill] sm:$0xff]  ;;  %v3579_v38 = vld [vmem:[#allocation17_spill] sm:$0xff] }
 0x3f3   :  { %1514 = vmatpush.msra.mxu2 %v2763_v40  ;;  %1534 = vmatpush.msra.mxu3 %v2769_v41  ;;  %v3580_v40 = vld [vmem:[#allocation31_spill] sm:$0xff]  ;;  %v3581_v41 = vld [vmem:[#allocation28_spill] sm:$0xff] }
 0x3f4   :  { %1475 = vmatpush.msra.mxu0 %v2775_v42  ;;  %1495 = vmatpush.msra.mxu1 %v2781_v57  ;;  %v3582_v42 = vld [vmem:[#allocation18_spill] sm:$0xff]  ;;  %v3583_v57 = vld [vmem:[#allocation19_spill] sm:$0xff] }
 0x3f5   :  { %1515 = vmatpush.msra.mxu2 %v2787_v60  ;;  %1535 = vmatpush.msra.mxu3 %v2793_v62  ;;  %v3584_v60 = vld [vmem:[#allocation33_spill] sm:$0xff]  ;;  %v3585_v62 = vld [vmem:[#allocation32_spill] sm:$0xff] }
 0x3f6   :  { %1476 = vmatpush.msra.mxu0 %v2799_v55  ;;  %1496 = vmatpush.msra.mxu1 %v2805_v2  ;;  %v3586_v55 = vld [vmem:[#allocation21_spill] sm:$0xff]  ;;  %v3587_v2 = vld [vmem:[#allocation22_spill] sm:$0xff] }
 0x3f7   :  { %1516 = vmatpush.msra.mxu2 %v2811_v10  ;;  %1536 = vmatpush.msra.mxu3 %v2817_v1  ;;  %v3588_v10 = vld [vmem:[#allocation35_spill] sm:$0xff]  ;;  %v3589_v1 = vld [vmem:[#allocation34_spill] sm:$0xff] }
 0x3f8   :  { %1477 = vmatpush.msra.mxu0 %v2981_v46  ;;  %1497 = vmatpush.msra.mxu1 %v2824_v51  ;;  %v3590_v51 = vld [vmem:[#allocation25_spill] sm:$0xff] }
 0x3f9   :  { %1517 = vmatpush.msra.mxu2 %v2830_v49  ;;  %1537 = vmatpush.msra.mxu3 %v2836_v11  ;;  %v3591_v49 = vld [vmem:[#allocation26_spill] sm:$0xff]  ;;  %v3592_v11 = vld [vmem:[#allocation37_spill] sm:$0xff] }
 0x3fa   :  { %1478 = vmatpush.msra.mxu0 %v2990_v27  ;;  %1498 = vmatpush.msra.mxu1 %v2843_v39  ;;  %v3593_v39 = vld [vmem:[#allocation36_spill] sm:$0xff] }
 0x3fb   :  { %1518 = vmatpush.msra.mxu2 %v2849_v58  ;;  %1538 = vmatpush.msra.mxu3 %v2855_v50  ;;  %v3594_v58 = vld [vmem:[#allocation29_spill] sm:$0xff] }
 0x3fc   :  { %1479 = vmatpush.msra.mxu0 %v2999_v28  ;;  %1499 = vmatpush.msra.mxu1 %v3005_v29 }
 0x3fd   :  { %1519 = vmatpush.msra.mxu2 %v2863_v43  ;;  %1539 = vmatpush.msra.mxu3 %v2869_v0 }
 0x3fe   :  { %1480 = vmatpush.msra.mxu0 %v3013_v30  ;;  %1500 = vmatpush.msra.mxu1 %v3019_v31  ;;  %v1108_v31 = vld [vmem:[#allocation4 + $0x5] ss:$8 sm:$0xf] }
 0x3ff   :  { %1520 = vmatpush.msra.mxu2 %v2877_v44  ;;  %1540 = vmatpush.msra.mxu3 %v2883_v47 }
 0x400   :  { %1481 = vmatpush.msra.mxu0 %v3027_v33  ;;  %1501 = vmatpush.msra.mxu1 %v3033_v34 }
 0x401   :  { %1521 = vmatpush.msra.mxu2 %v2891_v48  ;;  %1541 = vmatpush.msra.mxu3 %v3570_v54 }
 0x402   :  { %1482 = vmatpush.msra.mxu0 %v3571_v4  ;;  %1502 = vmatpush.msra.mxu1 %v3572_v5 }
 0x403   :  { %1522 = vmatpush.msra.mxu2 %v3573_v12  ;;  %1542 = vmatpush.msra.mxu3 %v3574_v13 }
 0x404   :  { %1483 = vmatpush.msra.mxu0 %v3575_v17  ;;  %1503 = vmatpush.msra.mxu1 %v3576_v18 }
 0x405   :  { %1523 = vmatpush.msra.mxu2 %v3577_v36  ;;  %1543 = vmatpush.msra.mxu3 %v3578_v37 }
 0x406   :  { %1484 = vmatpush.msra.mxu0 %v3579_v38  ;;  %1504 = vmatpush.msra.mxu1 %v3580_v40 }
 0x407   :  { %1524 = vmatpush.msra.mxu2 %v3581_v41  ;;  %1544 = vmatpush.msra.mxu3 %v3582_v42 }
 0x408   :  { %1485 = vmatpush.msra.mxu0 %v3583_v57  ;;  %1505 = vmatpush.msra.mxu1 %v3584_v60 }
 0x409   :  { %1525 = vmatpush.msra.mxu2 %v3585_v62  ;;  %1545 = vmatpush.msra.mxu3 %v3586_v55 }
 0x40a   :  { %1486 = vmatpush.msra.mxu0 %v3587_v2  ;;  %1506 = vmatpush.msra.mxu1 %v3588_v10 }
 0x40b   :  { %1526 = vmatpush.msra.mxu2 %v3589_v1  ;;  %1546 = vmatpush.msra.mxu3 %v3590_v51 }
 0x40c   :  { %1487 = vmatpush.msra.mxu0 %v3591_v49  ;;  %1507 = vmatpush.msra.mxu1 %v3592_v11 }
 0x40d   :  { %1527 = vmatpush.msra.mxu2 %v3593_v39  ;;  %1547 = vmatpush.msra.mxu3 %v3594_v58 }
 0x469   :  { %v1155_v50 = vpop.f32.mrf.mxu1  ;;  %v1135_v46 = vpop.f32.mrf.mxu0 }
 0x46a   :  { %v1202_v43 = vrot.slane %v1155_v50, 7 }
 0x46c   :  { %v1205_v27 = vsel %vm311_vm3, %v1135_v46, %v1202_v43  ;;  %v1208_v28 = vsel %vm317_vm4, %v1135_v46, %v1202_v43 }
 0x470   :  { %v1175_v0 = vpop.f32.mrf.mxu2  ;;  %v1195_v44 = vpop.f32.mrf.mxu3 }
 0x471   :  { %v1203_v47 = vrot.slane %v1175_v0, 6  ;;  %v1204_v48 = vrot.slane %v1195_v44, 5 }
 0x473   :  { %v1206_v29 = vsel %vm313_vm1, %v1203_v47, %v1204_v48  ;;  %v1209_v30 = vsel %vm319_vm2, %v1203_v47, %v1204_v48 }
 0x474   :  { %v1207_v33 = vsel %vm315_vm5, %v1205_v27, %v1206_v29  ;;  %v1210_v34 = vsel %vm321_vm6, %v1208_v28, %v1209_v30  ;;  %v1285_v30 = vld [vmem:[#allocation4 + $0x6] ss:$8 sm:$0xf] }
 0x475   :  { %v1211_v8 = vrot.slane %v1210_v34, 1  ;;  %v1214_v52 = vadd.f32 %v1207_v33, %v1108_v31 }
 0x477   :  { %v1215_v53 = vadd.f32 %v1211_v8, %v1110_v22  ;;  %v1736_v63 = vmul.f32 -1.442695, %v1214_v52  ;;  %v1256_v24 = vrot.slane %v1214_v52, 3  ;;  %v1287_v52 = vld [vmem:[#allocation4 + $0x26] ss:$8 sm:$0xf] }
 0x479   :  { %1828 = vpow2.f32 %v1736_v63  ;;  %v1737_v16 = vmul.f32 -1.442695, %v1215_v53  ;;  %v1257_v45 = vrot.slane %v1215_v53, 3 }
 0x47b   :  { %1830 = vpow2.f32 %v1737_v16 }
 0x47f   :  { %v1829_v7 = vpop.eup %1828 }
 0x480   :  { %v1222_v61 = vadd.f32 1.0, %v1829_v7 }
 0x481   :  { %v1831_v14 = vpop.eup %1830 }
 0x482   :  { %v1223_v25 = vadd.f32 1.0, %v1831_v14  ;;  %1832 = vrcp.f32 %v1222_v61  ;;  %v1235_v35 = vand.u32 2147483648, %v1222_v61  ;;  %v1233_v6 = vand.u32 2147483647, %v1222_v61 }
 0x483   :  { %vm1229_vm8 = vweird.f32 %v1222_v61 }
 0x484   :  { %1834 = vrcp.f32 %v1223_v25  ;;  %v1250_v19 = vand.u32 2147483648, %v1223_v25  ;;  %v1248_v4 = vand.u32 2147483647, %v1223_v25  ;;  %v1236_v5 = vor.u32 1.1754944e-38, %v1235_v35 }
 0x485   :  { %1836 = vtanh.f32 %v1256_v24  ;;  %vm1234_vm11 = vcmp.eq.f32.partialorder %v1233_v6, 8.507059e+37  ;;  %vm1244_vm12 = vweird.f32 %v1223_v25 }
 0x486   :  { %1838 = vtanh.f32 %v1257_v45  ;;  %v1251_v18 = vor.u32 1.1754944e-38, %v1250_v19  ;;  %vm1249_vm14 = vcmp.eq.f32.partialorder %v1248_v4, 8.507059e+37 }
 0x488   :  { %v1833_v20 = vpop.eup %1832 }
 0x489   :  { %v1225_v23 = vmul.f32 %v1833_v20, %v1222_v61  ;;  %vm1230_vm7 = vweird.f32 %v1833_v20 }
 0x48a   :  { %v1835_v15 = vpop.eup %1834  ;;  %vm1231_vm10 = vmor %vm1229_vm8, %vm1230_vm7 }
 0x48b   :  { %v1226_v9 = vsub.f32 1.0, %v1225_v23  ;;  %v1240_v32 = vmul.f32 %v1835_v15, %v1223_v25  ;;  %vm1245_vm9 = vweird.f32 %v1835_v15  ;;  %v1837_v38 = vpop.eup %1836 }
 0x48c   :  { %vm1246_vm13 = vmor %vm1244_vm12, %vm1245_vm9  ;;  %v1839_v60 = vpop.eup %1838 }
 0x48d   :  { %v1227_v3 = vmul.f32 %v1833_v20, %v1226_v9  ;;  %v1241_v26 = vsub.f32 1.0, %v1240_v32 }
 0x48f   :  { %v1228_v21 = vadd.f32 %v1833_v20, %v1227_v3  ;;  %v1242_v54 = vmul.f32 %v1835_v15, %v1241_v26 }
 0x491   :  { %v1232_v12 = vsel %vm1231_vm10, %v1833_v20, %v1228_v21  ;;  %v1243_v13 = vadd.f32 %v1835_v15, %v1242_v54 }
 0x492   :  { %v1237_v17 = vsel %vm1234_vm11, %v1236_v5, %v1232_v12 }
 0x493   :  { %v1247_v36 = vsel %vm1246_vm13, %v1835_v15, %v1243_v13  ;;  %v1264_v37 = vrot.slane %v1237_v17, 1  ;;  %v1270_v57 = vmul.f32 %v1837_v38, %v1237_v17  ;;  %v1276_v1 = vrot.slane %v1237_v17, 2 }
 0x494   :  { %v1252_v40 = vsel %vm1249_vm14, %v1251_v18, %v1247_v36 }
 0x495   :  { %v1265_v41 = vrot.slane %v1252_v40, 1  ;;  %v1268_v42 = vmul.f32 %v1264_v37, %v3248_v56  ;;  %v1271_v55 = vmul.f32 %v1839_v60, %v1252_v40  ;;  %v1277_v49 = vrot.slane %v1252_v40, 2 }
 0x497   :  { %v1269_v62 = vmul.f32 %v1265_v41, %v3250_v59  ;;  %v3326_v2 = vadd.f32 %v1270_v57, %v1268_v42 }
 0x499   :  { %v3328_v10 = vadd.f32 %v1271_v55, %v1269_v62  ;;  %1840 = vtanh.f32 %v3326_v2 }
 0x49b   :  { %1842 = vtanh.f32 %v3328_v10 }
 0x49f   :  { %v1841_v51 = vpop.eup %1840 }
 0x4a0   :  { %v1280_v11 = vmul.f32 %v1841_v51, %v1276_v1 }
 0x4a1   :  { %v1843_v39 = vpop.eup %1842 }
 0x4a2   :  { %v1281_v58 = vmul.f32 %v1843_v39, %v1277_v49  ;;  %1282 = vst [vmem:[#allocation5 + $0x5] sm:$0x1] %v1280_v11 }
 0x4a3   :  { %1290 = vst [vmem:[#allocation1] ss:$9 sm:$0xff] %v1280_v11 }
 0x4a4   :  { %1283 = vst [vmem:[#allocation5 + $0xd] sm:$0x1] %v1281_v58 }
 0x4a5   :  { %1292 = vst [vmem:[#allocation1 + $0x1] ss:$9 sm:$0xff] %v1281_v58 }
 0x4ac   :  { %v1293_v56 = vld [vmem:[#allocation1] sm:$0xff] }
 0x4ad   :  { %1311 = vmatmul.f32.vlgmr.msrb.gmra.mxu0 %v1293_v56  ;;  %1331 = vmatmul.f32.vlgmr.msrb.gmra.mxu1 %v1293_v56 }
 0x4ae   :  { %1351 = vmatmul.f32.vlgmr.msrb.gmra.mxu2 %v1293_v56  ;;  %1371 = vmatmul.f32.vlgmr.msrb.gmra.mxu3 %v1293_v56 }
 0x52a   :  { %v1332_v59 = vpop.f32.mrf.mxu1  ;;  %v1312_v48 = vpop.f32.mrf.mxu0 }
 0x52b   :  { %v1379_v50 = vrot.slane %v1332_v59, 7 }
 0x52d   :  { %v1382_v46 = vsel %vm311_vm3, %v1312_v48, %v1379_v50  ;;  %v1385_v27 = vsel %vm317_vm4, %v1312_v48, %v1379_v50 }
 0x531   :  { %v1352_v43 = vpop.f32.mrf.mxu2  ;;  %v1372_v0 = vpop.f32.mrf.mxu3 }
 0x532   :  { %v1380_v44 = vrot.slane %v1352_v43, 6  ;;  %v1381_v47 = vrot.slane %v1372_v0, 5 }
 0x534   :  { %v1383_v28 = vsel %vm313_vm1, %v1380_v44, %v1381_v47  ;;  %v1386_v29 = vsel %vm319_vm2, %v1380_v44, %v1381_v47 }
 0x535   :  { %v1384_v31 = vsel %vm315_vm5, %v1382_v46, %v1383_v28  ;;  %v1387_v33 = vsel %vm321_vm6, %v1385_v27, %v1386_v29  ;;  %v1462_v29 = vld [vmem:[#allocation4 + $0x7] ss:$8 sm:$0xf] }
 0x536   :  { %v1388_v34 = vrot.slane %v1387_v33, 1  ;;  %v1391_v8 = vadd.f32 %v1384_v31, %v1285_v30 }
 0x538   :  { %v1392_v22 = vadd.f32 %v1388_v34, %v1287_v52  ;;  %v1738_v53 = vmul.f32 -1.442695, %v1391_v8  ;;  %v1433_v15 = vrot.slane %v1391_v8, 3  ;;  %v1464_v8 = vld [vmem:[#allocation4 + $0x27] ss:$8 sm:$0xf] }
 0x53a   :  { %1844 = vpow2.f32 %v1738_v53  ;;  %v1739_v63 = vmul.f32 -1.442695, %v1392_v22  ;;  %v1434_v35 = vrot.slane %v1392_v22, 3 }
 0x53c   :  { %1846 = vpow2.f32 %v1739_v63 }
 0x540   :  { %v1845_v16 = vpop.eup %1844 }
 0x541   :  { %v1399_v7 = vadd.f32 1.0, %v1845_v16 }
 0x542   :  { %v1847_v61 = vpop.eup %1846 }
 0x543   :  { %v1400_v14 = vadd.f32 1.0, %v1847_v61  ;;  %1848 = vrcp.f32 %v1399_v7  ;;  %v1412_v32 = vand.u32 2147483648, %v1399_v7  ;;  %v1410_v3 = vand.u32 2147483647, %v1399_v7 }
 0x544   :  { %vm1406_vm0 = vweird.f32 %v1399_v7 }
 0x545   :  { %1850 = vrcp.f32 %v1400_v14  ;;  %v1427_v26 = vand.u32 2147483648, %v1400_v14  ;;  %v1425_v54 = vand.u32 2147483647, %v1400_v14  ;;  %v1413_v4 = vor.u32 1.1754944e-38, %v1412_v32 }
 0x546   :  { %1852 = vtanh.f32 %v1433_v15  ;;  %vm1411_vm9 = vcmp.eq.f32.partialorder %v1410_v3, 8.507059e+37  ;;  %vm1421_vm10 = vweird.f32 %v1400_v14 }
 0x547   :  { %1854 = vtanh.f32 %v1434_v35  ;;  %v1428_v17 = vor.u32 1.1754944e-38, %v1427_v26  ;;  %vm1426_vm12 = vcmp.eq.f32.partialorder %v1425_v54, 8.507059e+37 }
 0x549   :  { %v1849_v25 = vpop.eup %1848 }
 0x54a   :  { %v1402_v20 = vmul.f32 %v1849_v25, %v1399_v7  ;;  %vm1407_vm15 = vweird.f32 %v1849_v25 }
 0x54b   :  { %v1851_v23 = vpop.eup %1850  ;;  %vm1408_vm8 = vmor %vm1406_vm0, %vm1407_vm15 }
 0x54c   :  { %v1403_v24 = vsub.f32 1.0, %v1402_v20  ;;  %v1417_v9 = vmul.f32 %v1851_v23, %v1400_v14  ;;  %vm1422_vm7 = vweird.f32 %v1851_v23  ;;  %v1853_v37 = vpop.eup %1852 }
 0x54d   :  { %vm1423_vm11 = vmor %vm1421_vm10, %vm1422_vm7  ;;  %v1855_v57 = vpop.eup %1854 }
 0x54e   :  { %v1404_v45 = vmul.f32 %v1849_v25, %v1403_v24  ;;  %v1418_v6 = vsub.f32 1.0, %v1417_v9 }
 0x550   :  { %v1405_v19 = vadd.f32 %v1849_v25, %v1404_v45  ;;  %v1419_v21 = vmul.f32 %v1851_v23, %v1418_v6 }
 0x552   :  { %v1409_v5 = vsel %vm1408_vm8, %v1849_v25, %v1405_v19  ;;  %v1420_v12 = vadd.f32 %v1851_v23, %v1419_v21 }
 0x553   :  { %v1414_v13 = vsel %vm1411_vm9, %v1413_v4, %v1409_v5 }
 0x554   :  { %v1424_v18 = vsel %vm1423_vm11, %v1851_v23, %v1420_v12  ;;  %v1441_v36 = vrot.slane %v1414_v13, 1  ;;  %v1447_v42 = vmul.f32 %v1853_v37, %v1414_v13  ;;  %v1453_v51 = vrot.slane %v1414_v13, 2 }
 0x555   :  { %v1429_v38 = vsel %vm1426_vm12, %v1428_v17, %v1424_v18 }
 0x556   :  { %v1442_v40 = vrot.slane %v1429_v38, 1  ;;  %v1445_v41 = vmul.f32 %v1441_v36, %v3326_v2  ;;  %v1448_v62 = vmul.f32 %v1855_v57, %v1429_v38  ;;  %v1454_v11 = vrot.slane %v1429_v38, 2 }
 0x558   :  { %v1446_v60 = vmul.f32 %v1442_v40, %v3328_v10  ;;  %v3340_v55 = vadd.f32 %v1447_v42, %v1445_v41 }
 0x55a   :  { %v3342_v1 = vadd.f32 %v1448_v62, %v1446_v60  ;;  %1856 = vtanh.f32 %v3340_v55 }
 0x55c   :  { %1858 = vtanh.f32 %v3342_v1 }
 0x560   :  { %v1857_v49 = vpop.eup %1856 }
 0x561   :  { %v1457_v39 = vmul.f32 %v1857_v49, %v1453_v51 }
 0x562   :  { %v1859_v58 = vpop.eup %1858 }
 0x563   :  { %v1458_v56 = vmul.f32 %v1859_v58, %v1454_v11  ;;  %1459 = vst [vmem:[#allocation5 + $0x6] sm:$0x1] %v1457_v39 }
 0x564   :  { %1467 = vst [vmem:[#allocation1] ss:$9 sm:$0xff] %v1457_v39 }
 0x565   :  { %1460 = vst [vmem:[#allocation5 + $0xe] sm:$0x1] %v1458_v56 }
 0x566   :  { %1469 = vst [vmem:[#allocation1 + $0x1] ss:$9 sm:$0xff] %v1458_v56 }
 0x56d   :  { %v1470_v2 = vld [vmem:[#allocation1] sm:$0xff] }
 0x56e   :  { %1488 = vmatmul.f32.vlgmr.msra.gmra.mxu0 %v1470_v2  ;;  %1508 = vmatmul.f32.vlgmr.msra.gmra.mxu1 %v1470_v2 }
 0x56f   :  { %1528 = vmatmul.f32.vlgmr.msra.gmra.mxu2 %v1470_v2  ;;  %1548 = vmatmul.f32.vlgmr.msra.gmra.mxu3 %v1470_v2 }
 0x5eb   :  { %v1509_v10 = vpop.f32.mrf.mxu1  ;;  %v1489_v47 = vpop.f32.mrf.mxu0 }
 0x5ec   :  { %v1556_v59 = vrot.slane %v1509_v10, 7 }
 0x5ee   :  { %v1559_v48 = vsel %vm311_vm3, %v1489_v47, %v1556_v59  ;;  %v1562_v46 = vsel %vm317_vm4, %v1489_v47, %v1556_v59 }
 0x5f2   :  { %v1529_v50 = vpop.f32.mrf.mxu2  ;;  %v1549_v43 = vpop.f32.mrf.mxu3 }
 0x5f3   :  { %v1557_v0 = vrot.slane %v1529_v50, 6  ;;  %v1558_v44 = vrot.slane %v1549_v43, 5 }
 0x5f5   :  { %v1560_v27 = vsel %vm313_vm1, %v1557_v0, %v1558_v44  ;;  %v1563_v28 = vsel %vm319_vm2, %v1557_v0, %v1558_v44 }
 0x5f6   :  { %v1561_v30 = vsel %vm315_vm5, %v1559_v48, %v1560_v27  ;;  %v1564_v31 = vsel %vm321_vm6, %v1562_v46, %v1563_v28 }
 0x5f7   :  { %v1565_v33 = vrot.slane %v1564_v31, 1  ;;  %v1568_v34 = vadd.f32 %v1561_v30, %v1462_v29 }
 0x5f9   :  { %v1569_v52 = vadd.f32 %v1565_v33, %v1464_v8  ;;  %v1740_v22 = vmul.f32 -1.442695, %v1568_v34  ;;  %v1610_v23 = vrot.slane %v1568_v34, 3 }
 0x5fb   :  { %1860 = vpow2.f32 %v1740_v22  ;;  %v1741_v53 = vmul.f32 -1.442695, %v1569_v52  ;;  %v1611_v32 = vrot.slane %v1569_v52, 3 }
 0x5fd   :  { %1862 = vpow2.f32 %v1741_v53 }
 0x601   :  { %v1861_v63 = vpop.eup %1860 }
 0x602   :  { %v1576_v16 = vadd.f32 1.0, %v1861_v63 }
 0x603   :  { %v1863_v7 = vpop.eup %1862 }
 0x604   :  { %v1577_v61 = vadd.f32 1.0, %v1863_v7  ;;  %1864 = vrcp.f32 %v1576_v16  ;;  %v1589_v9 = vand.u32 2147483648, %v1576_v16  ;;  %v1587_v45 = vand.u32 2147483647, %v1576_v16 }
 0x605   :  { %vm1583_vm2 = vweird.f32 %v1576_v16 }
 0x606   :  { %1866 = vrcp.f32 %v1577_v61  ;;  %v1604_v6 = vand.u32 2147483648, %v1577_v61  ;;  %v1602_v21 = vand.u32 2147483647, %v1577_v61  ;;  %v1590_v54 = vor.u32 1.1754944e-38, %v1589_v9 }
 0x607   :  { %1868 = vtanh.f32 %v1610_v23  ;;  %vm1588_vm5 = vcmp.eq.f32.partialorder %v1587_v45, 8.507059e+37  ;;  %vm1598_vm6 = vweird.f32 %v1577_v61 }
 0x608   :  { %1870 = vtanh.f32 %v1611_v32  ;;  %v1605_v13 = vor.u32 1.1754944e-38, %v1604_v6  ;;  %vm1603_vm14 = vcmp.eq.f32.partialorder %v1602_v21, 8.507059e+37 }
 0x60a   :  { %v1865_v14 = vpop.eup %1864 }
 0x60b   :  { %v1579_v25 = vmul.f32 %v1865_v14, %v1576_v16  ;;  %vm1584_vm1 = vweird.f32 %v1865_v14 }
 0x60c   :  { %v1867_v20 = vpop.eup %1866  ;;  %vm1585_vm4 = vmor %vm1583_vm2, %vm1584_vm1 }
 0x60d   :  { %v1580_v15 = vsub.f32 1.0, %v1579_v25  ;;  %v1594_v24 = vmul.f32 %v1867_v20, %v1577_v61  ;;  %vm1599_vm3 = vweird.f32 %v1867_v20  ;;  %v1869_v36 = vpop.eup %1868 }
 0x60e   :  { %vm1600_vm13 = vmor %vm1598_vm6, %vm1599_vm3  ;;  %v1871_v42 = vpop.eup %1870 }
 0x60f   :  { %v1581_v35 = vmul.f32 %v1865_v14, %v1580_v15  ;;  %v1595_v3 = vsub.f32 1.0, %v1594_v24 }
 0x611   :  { %v1582_v26 = vadd.f32 %v1865_v14, %v1581_v35  ;;  %v1596_v19 = vmul.f32 %v1867_v20, %v1595_v3 }
 0x613   :  { %v1586_v4 = vsel %vm1585_vm4, %v1865_v14, %v1582_v26  ;;  %v1597_v5 = vadd.f32 %v1867_v20, %v1596_v19 }
 0x614   :  { %v1591_v12 = vsel %vm1588_vm5, %v1590_v54, %v1586_v4 }
 0x615   :  { %v1601_v17 = vsel %vm1600_vm13, %v1867_v20, %v1597_v5  ;;  %v1618_v18 = vrot.slane %v1591_v12, 1  ;;  %v1624_v41 = vmul.f32 %v1869_v36, %v1591_v12  ;;  %v1630_v49 = vrot.slane %v1591_v12, 2 }
 0x616   :  { %v1606_v37 = vsel %vm1603_vm14, %v1605_v13, %v1601_v17 }
 0x617   :  { %v1619_v38 = vrot.slane %v1606_v37, 1  ;;  %v1622_v40 = vmul.f32 %v1618_v18, %v3340_v55  ;;  %v1625_v60 = vmul.f32 %v1871_v42, %v1606_v37  ;;  %v1631_v39 = vrot.slane %v1606_v37, 2 }
 0x619   :  { %v1623_v57 = vmul.f32 %v1619_v38, %v3342_v1  ;;  %v1626_v62 = vadd.f32 %v1624_v41, %v1622_v40 }
 0x61b   :  { %v1627_v51 = vadd.f32 %v1625_v60, %v1623_v57  ;;  %1872 = vtanh.f32 %v1626_v62 }
 0x61d   :  { %1874 = vtanh.f32 %v1627_v51 }
 0x621   :  { %v1873_v11 = vpop.eup %1872 }
 0x622   :  { %v1634_v58 = vmul.f32 %v1873_v11, %v1630_v49 }
 0x623   :  { %v1875_v55 = vpop.eup %1874 }
 0x624   :  { %v1635_v56 = vmul.f32 %v1875_v55, %v1631_v39  ;;  %1636 = vst [vmem:[#allocation5 + $0x7] sm:$0x1] %v1634_v58 }
 0x625   :  { %1640 = vst [vmem:[#allocation1] ss:$9 sm:$0xff] %v1634_v58 }
 0x626   :  { %1637 = vst [vmem:[#allocation5 + $0xf] sm:$0x1] %v1635_v56 }
 0x627   :  { %1642 = vst [vmem:[#allocation1 + $0x1] ss:$9 sm:$0xff] %v1635_v56  ;;  %1681 = dma.vmem_to_hbm [thread:$0]  %s1674_s13, 256, %s1676_s16, [#allocation6], %s2018_s17, %s2018_s17, %s2019_s18  }
 0x62e   :  { %v1643_v1 = vld [vmem:[#allocation1] sm:$0xff] }
 0x62f   :  { %1645 = vst [vmem:[#allocation2] sm:$0x3] %v1643_v1 }
 0x630   :  { %1648 = vst [vmem:[#allocation1] ss:$9 sm:$0xff] %v1626_v62 }
 0x631   :  { %1650 = vst [vmem:[#allocation1 + $0x1] ss:$9 sm:$0xff] %v1627_v51 }
 0x638   :  { %v1651_v2 = vld [vmem:[#allocation1] sm:$0xff] }
 0x639   :  { %1653 = vst [vmem:[#allocation3] sm:$0x3] %v1651_v2 }
 0x63a   :  { %1657 = vst [vmem:[#allocation1] ss:$9 sm:$0xff] %v1634_v58 }
 0x63b   :  { %1659 = vst [vmem:[#allocation1 + $0x1] ss:$9 sm:$0xff] %v1635_v56 }
 0x642   :  { %v1660_v10 = vld [vmem:[#allocation1] sm:$0xff] }
 0x643   :  { %1662 = vst [vmem:[#allocation7] sm:$0x3] %v1660_v10 }
 0x644   :  { %1692 = dma.vmem_to_hbm [thread:$0]  %s1688_s19, 32, %s1690_s21, [#allocation8]   ;;  %1663 = vst [vmem:[#allocation1] ss:$9 sm:$0xff] %v1626_v62 }
 0x645   :  { %1665 = vst [vmem:[#allocation1 + $0x1] ss:$9 sm:$0xff] %v1627_v51 }
 0x64c   :  { %v1666_v59 = vld [vmem:[#allocation1] sm:$0xff] }
 0x64d   :  { %1668 = vst [vmem:[#allocation9] sm:$0x3] %v1666_v59 }
 0x64e   :  { %1703 = dma.vmem_to_hbm [thread:$0]  %s1699_s23, 32, %s1701_s26, [#allocation8]  }
 0x64f   :  { %2012 = dma.done.wait [#allocation6], 256  }
 0x650   :  { %2013 = vsyncadd [#allocation6], 4294967040 }
 0x651   :  { %2014 = dma.done.wait [#allocation8], 64  }
 0x652   :  { %2015 = vsyncadd [#allocation8], 4294967232 }
 0x653   :  { %1716 = vsyncpa [#allocation6], 1 }
 0x654   :  { %1717 = vsyncpa [#allocation8], 1 }

</bundles_post_ra>
